<compile_context>
chip_gen: v6e
topology: v6e:2x2x1
jax: 0.10.0
libtpu: 0.0.40
codegen_flags: <defaults>
</compile_context>

<pallas_src>
import functools

import jax
import jax.numpy as jnp
import numpy as np
from jax.experimental import pallas as pl
from jax.experimental.pallas import tpu as pltpu


# ----------------------------------------------------------------------------
# Fused kernel: one grid step == one encoder layer over the whole batch.
# ----------------------------------------------------------------------------
def fused_transformer_kernel(x_ref,
                             wqkv_ref, bqkv_ref, wo_ref, bo_ref,
                             w1_ref, b1_ref, w2_ref, b2_ref,
                             g1_ref, be1_ref, g2_ref, be2_ref,
                             fcw_ref, fcb_ref,
                             out_ref,
                             act_ref,
                             *, B, S, D, H, eps=1e-5):
    layer = pl.program_id(0)
    Dh = D // H

    # Load the input activations into the persistent VMEM scratch once and
    # give the (tiny) output buffer a deterministic value.
    @pl.when(layer == 0)
    def _():
        act_ref[...] = x_ref[...].reshape(B * S, D)
        out_ref[...] = jnp.zeros_like(out_ref)

    x = act_ref[...]                                                 # (B*S, D)

    # ---- fused QKV projection for the whole batch.
    #      Weights pre-transposed to (in, out); 1/sqrt(Dh) folded into Q. ----
    qkv = jnp.dot(x, wqkv_ref[...],
                  preferred_element_type=jnp.float32) + bqkv_ref[...]  # (B*S, 3D)

    # ---- multi-head attention. (B, H) unrolled (all static slices); head
    #      outputs concatenated along lanes so one full-width Wo matmul
    #      handles all heads at once. ----
    per_batch = []
    for b in range(B):
        r0 = b * S
        heads = []
        for h in range(H):
            c = h * Dh
            q_h = qkv[r0:r0 + S, c:c + Dh]                           # (S, Dh)
            k_h = qkv[r0:r0 + S, D + c:D + c + Dh]                   # (S, Dh)
            v_h = qkv[r0:r0 + S, 2 * D + c:2 * D + c + Dh]           # (S, Dh)
            s = jax.lax.dot_general(q_h, k_h, (((1,), (1,)), ((), ())),
                                    preferred_element_type=jnp.float32)  # (S, S)
            s = s - jnp.max(s, axis=-1, keepdims=True)
            p = jnp.exp(s)
            p = p * pl.reciprocal(jnp.sum(p, axis=-1, keepdims=True),
                                  approx=True)
            heads.append(jnp.dot(p, v_h,
                                 preferred_element_type=jnp.float32))    # (S, Dh)
        per_batch.append(jnp.concatenate(heads, axis=-1))            # (S, D)
    attn = jnp.concatenate(per_batch, axis=0)                        # (B*S, D)

    # ---- single output projection for all heads / whole batch ----
    attn = jnp.dot(attn, wo_ref[...],
                   preferred_element_type=jnp.float32) + bo_ref[...]

    # ---- residual + LayerNorm 1 (post-norm) ----
    y = x + attn
    mu = jnp.mean(y, axis=-1, keepdims=True)
    var = jnp.mean((y - mu) ** 2, axis=-1, keepdims=True)
    y = (y - mu) * jax.lax.rsqrt(var + eps) * g1_ref[...] + be1_ref[...]

    # ---- feed-forward: relu(y @ W1 + b1) @ W2 + b2 ----
    hid = jnp.dot(y, w1_ref[...],
                  preferred_element_type=jnp.float32) + b1_ref[...]
    hid = jnp.maximum(hid, 0.0)
    ffn = jnp.dot(hid, w2_ref[...],
                  preferred_element_type=jnp.float32) + b2_ref[...]

    # ---- residual + LayerNorm 2 ----
    z = y + ffn
    mu2 = jnp.mean(z, axis=-1, keepdims=True)
    var2 = jnp.mean((z - mu2) ** 2, axis=-1, keepdims=True)
    z = (z - mu2) * jax.lax.rsqrt(var2 + eps) * g2_ref[...] + be2_ref[...]

    act_ref[...] = z

    # ---- final linear head on the last sequence position, fused into the
    #      last layer's grid step ----
    @pl.when(layer == pl.num_programs(0) - 1)
    def _():
        last = jnp.concatenate(
            [z[b * S + S - 1:b * S + S, :] for b in range(B)], axis=0)  # (B, D)
        out_ref[...] = (jnp.sum(last * fcw_ref[...], axis=-1, keepdims=True)
                        + fcb_ref[...])                              # (B, 1)


# ----------------------------------------------------------------------------
# Host-side packing: stack layers, pre-transpose weights, fold attention scale.
# ----------------------------------------------------------------------------
def pack_params(params):
    layers = params["layers"]
    H = params["num_heads"]
    D = layers[0]["wo"].shape[0]
    Dh = D // H
    scale = jnp.float32(1.0 / np.sqrt(Dh))

    def qkv_w(p):   # (3D, D) torch (out,in) -> scaled Q rows -> (D, 3D) (in,out)
        w = jnp.concatenate([p["wqkv"][:D] * scale, p["wqkv"][D:]], axis=0)
        return w.T

    def qkv_b(p):   # (1, 3D) with scaled Q columns
        b = p["bqkv"]
        return jnp.concatenate([b[:, :D] * scale, b[:, D:]], axis=1)

    return dict(
        wqkv=jnp.stack([qkv_w(p) for p in layers]),          # (L, D, 3D)
        bqkv=jnp.stack([qkv_b(p) for p in layers]),          # (L, 1, 3D)
        wo=jnp.stack([p["wo"].T for p in layers]),            # (L, D, D)
        bo=jnp.stack([p["bo"] for p in layers]),               # (L, 1, D)
        w1=jnp.stack([p["w1"].T for p in layers]),             # (L, D, Dff)
        b1=jnp.stack([p["b1"] for p in layers]),                # (L, 1, Dff)
        w2=jnp.stack([p["w2"].T for p in layers]),              # (L, Dff, D)
        b2=jnp.stack([p["b2"] for p in layers]),                 # (L, 1, D)
        g1=jnp.stack([p["g1"] for p in layers]),                 # (L, 1, D)
        be1=jnp.stack([p["be1"] for p in layers]),
        g2=jnp.stack([p["g2"] for p in layers]),
        be2=jnp.stack([p["be2"] for p in layers]),
    )


def transformer_forward(x, params):
    B, S, D = x.shape
    H = params["num_heads"]
    L = len(params["layers"])
    assert D % H == 0
    packed = pack_params(params)

    names = ["wqkv", "bqkv", "wo", "bo", "w1", "b1", "w2", "b2",
             "g1", "be1", "g2", "be2"]
    w_args = [packed[n] for n in names]

    def layer_spec(arr):
        # Squeeze the leading layer axis; each step sees one layer's full tensor.
        return pl.BlockSpec((None,) + arr.shape[1:], lambda l: (l, 0, 0))

    grid_spec = pltpu.PrefetchScalarGridSpec(
        num_scalar_prefetch=0,
        grid=(L,),
        in_specs=[pl.BlockSpec((B, S, D), lambda l: (0, 0, 0))]   # resident input
                 + [layer_spec(w) for w in w_args]
                 + [pl.BlockSpec((1, D), lambda l: (0, 0)),       # fc_w
                    pl.BlockSpec((1, 1), lambda l: (0, 0))],      # fc_b
        out_specs=pl.BlockSpec((B, 1), lambda l: (0, 0)),
        scratch_shapes=[pltpu.VMEM((B * S, D), jnp.float32)],     # activations
    )

    return pl.pallas_call(
        functools.partial(fused_transformer_kernel, B=B, S=S, D=D, H=H),
        out_shape=jax.ShapeDtypeStruct((B, 1), jnp.float32),
        grid_spec=grid_spec,
        compiler_params=pltpu.CompilerParams(
            dimension_semantics=("arbitrary",)),   # layers are sequential
    )(x, *w_args, params["fc_w"], params["fc_b"])


# ----------------------------------------------------------------------------
# Deterministic parameter init (PyTorch weight convention: (out, in))
# ----------------------------------------------------------------------------
def init_params(key, feature_size, num_layers, num_heads, forward_expansion):
    D = feature_size
    Dff = D * forward_expansion
    layers = []
    for _ in range(num_layers):
        key, *ks = jax.random.split(key, 7)
        layers.append(dict(
            wqkv=jax.random.normal(ks[0], (3 * D, D), jnp.float32) * 0.05,
            bqkv=jax.random.normal(ks[1], (1, 3 * D), jnp.float32) * 0.02,
            wo=jax.random.normal(ks[2], (D, D), jnp.float32) * 0.05,
            bo=jax.random.normal(ks[3], (1, D), jnp.float32) * 0.02,
            w1=jax.random.normal(ks[4], (Dff, D), jnp.float32) * 0.05,
            b1=jnp.zeros((1, Dff), jnp.float32),
            w2=jax.random.normal(ks[5], (D, Dff), jnp.float32) * 0.05,
            b2=jnp.zeros((1, D), jnp.float32),
            g1=jnp.ones((1, D), jnp.float32),
            be1=jnp.zeros((1, D), jnp.float32),
            g2=jnp.ones((1, D), jnp.float32),
            be2=jnp.zeros((1, D), jnp.float32),
        ))
    key, k1, k2 = jax.random.split(key, 3)
    return dict(
        layers=layers,
        num_heads=num_heads,
        fc_w=jax.random.normal(k1, (1, D), jnp.float32) * 0.05,
        fc_b=jax.random.normal(k2, (1, 1), jnp.float32) * 0.02,
    )


# ----------------------------------------------------------------------------
# Pure-JAX reference (mirrors PyTorch inference semantics) for verification
# ----------------------------------------------------------------------------
def ref_layer(x, p, H, eps=1e-5):
    B, S, D = x.shape
    Dh = D // H
    qkv = jnp.einsum("bsd,ed->bse", x, p["wqkv"]) + p["bqkv"][0]
    q, k, v = jnp.split(qkv, 3, axis=-1)

    def split_heads(t):
        return t.reshape(B, S, H, Dh).transpose(0, 2, 1, 3)

    q, k, v = split_heads(q) / (Dh ** 0.5), split_heads(k), split_heads(v)
    s = jnp.einsum("bhqd,bhkd->bhqk", q, k)
    pmat = jax.nn.softmax(s, axis=-1)
    o = jnp.einsum("bhqk,bhkd->bhqd", pmat, v).transpose(0, 2, 1, 3).reshape(B, S, D)
    o = jnp.einsum("bsd,ed->bse", o, p["wo"]) + p["bo"][0]

    def ln(t, g, b):
        mu = jnp.mean(t, -1, keepdims=True)
        var = jnp.mean((t - mu) ** 2, -1, keepdims=True)
        return (t - mu) * jax.lax.rsqrt(var + eps) * g[0] + b[0]

    y = ln(x + o, p["g1"], p["be1"])
    h = jnp.maximum(jnp.einsum("bsd,ed->bse", y, p["w1"]) + p["b1"][0], 0.0)
    f = jnp.einsum("bse,de->bsd", h, p["w2"]) + p["b2"][0]
    return ln(y + f, p["g2"], p["be2"])


def ref_forward(x, params):
    for p in params["layers"]:
        x = ref_layer(x, p, params["num_heads"])
    return x[:, -1, :] @ params["fc_w"].T + params["fc_b"]


# ----------------------------------------------------------------------------
if __name__ == "__main__":
    # TODO(synk): dropout (identity at inference) and src/key-padding masks are
    # not implemented — the reference module's forward never uses them.
    feature_size, num_layers, num_heads, forward_expansion = 32, 2, 4, 4
    B, S = 2, 8

    key = jax.random.PRNGKey(0)
    kx, kp = jax.random.split(key)
    x = jax.random.normal(kx, (B, S, feature_size), jnp.float32)
    params = init_params(kp, feature_size, num_layers, num_heads, forward_expansion)

    out = transformer_forward(x, params)
    out = jax.block_until_ready(out)

    ref = ref_forward(x, params)
    np.testing.assert_allclose(np.asarray(out), np.asarray(ref), rtol=3e-3, atol=3e-3)
    assert out.shape == (B, 1)

    print("KERNEL_OK")
</pallas_src>

<mosaic_0001>
module attributes {stable_mosaic.version = 11 : i64} {
  func.func @fused_transformer_kernel(%arg0: i32, %arg1: memref<2x8x32xf32, #tpu.memory_space<vmem>>, %arg2: memref<1x32x96xf32, #tpu.memory_space<vmem>>, %arg3: memref<1x1x96xf32, #tpu.memory_space<vmem>>, %arg4: memref<1x32x32xf32, #tpu.memory_space<vmem>>, %arg5: memref<1x1x32xf32, #tpu.memory_space<vmem>>, %arg6: memref<1x32x128xf32, #tpu.memory_space<vmem>>, %arg7: memref<1x1x128xf32, #tpu.memory_space<vmem>>, %arg8: memref<1x128x32xf32, #tpu.memory_space<vmem>>, %arg9: memref<1x1x32xf32, #tpu.memory_space<vmem>>, %arg10: memref<1x1x32xf32, #tpu.memory_space<vmem>>, %arg11: memref<1x1x32xf32, #tpu.memory_space<vmem>>, %arg12: memref<1x1x32xf32, #tpu.memory_space<vmem>>, %arg13: memref<1x1x32xf32, #tpu.memory_space<vmem>>, %arg14: memref<1x32xf32, #tpu.memory_space<vmem>>, %arg15: memref<1x1xf32, #tpu.memory_space<vmem>>, %arg16: memref<2x1xf32, #tpu.memory_space<vmem>>, %arg17: memref<16x32xf32, #tpu.memory_space<vmem>>) attributes {dimension_semantics = [#tpu.dimension_semantics<arbitrary>], iteration_bounds = array<i64: 2>, scalar_prefetch = 0 : i64, scratch_operands = 1 : i64, tpu.core_type = #tpu.core_type<tc>, window_params = [{pipeline_mode = #tpu.pipeline_mode<synchronous>, transform_indices = @transform_0, window_bounds = array<i64: 2, 8, 32>}, {transform_indices = @transform_1, window_bounds = array<i64: 1, 32, 96>}, {transform_indices = @transform_2, window_bounds = array<i64: 1, 1, 96>}, {transform_indices = @transform_3, window_bounds = array<i64: 1, 32, 32>}, {transform_indices = @transform_4, window_bounds = array<i64: 1, 1, 32>}, {transform_indices = @transform_5, window_bounds = array<i64: 1, 32, 128>}, {transform_indices = @transform_6, window_bounds = array<i64: 1, 1, 128>}, {transform_indices = @transform_7, window_bounds = array<i64: 1, 128, 32>}, {transform_indices = @transform_8, window_bounds = array<i64: 1, 1, 32>}, {transform_indices = @transform_9, window_bounds = array<i64: 1, 1, 32>}, {transform_indices = @transform_10, window_bounds = array<i64: 1, 1, 32>}, {transform_indices = @transform_11, window_bounds = array<i64: 1, 1, 32>}, {transform_indices = @transform_12, window_bounds = array<i64: 1, 1, 32>}, {pipeline_mode = #tpu.pipeline_mode<synchronous>, transform_indices = @transform_13, window_bounds = array<i64: 1, 32>}, {pipeline_mode = #tpu.pipeline_mode<synchronous>, transform_indices = @transform_14, window_bounds = array<i64: 1, 1>}, {pipeline_mode = #tpu.pipeline_mode<synchronous>, transform_indices = @transform_15, window_bounds = array<i64: 2, 1>}]} {
    %c0_i32 = arith.constant 0 : i32
    %0 = arith.cmpi eq, %arg0, %c0_i32 : i32
    %1 = arith.extui %0 : i1 to i32
    %c0_i32_0 = arith.constant 0 : i32
    %2 = arith.cmpi ne, %1, %c0_i32_0 : i32
    scf.if %2 {
      %c0_87 = arith.constant 0 : index
      %c0_88 = arith.constant 0 : index
      %c0_89 = arith.constant 0 : index
      %215 = vector.load %arg1[%c0_87, %c0_88, %c0_89] : memref<2x8x32xf32, #tpu.memory_space<vmem>>, vector<2x8x32xf32>
      %216 = vector.shape_cast %215 : vector<2x8x32xf32> to vector<16x32xf32>
      %c0_90 = arith.constant 0 : index
      %c0_91 = arith.constant 0 : index
      %217 = vector.load %arg17[%c0_90, %c0_91] : memref<16x32xf32, #tpu.memory_space<vmem>>, vector<16x32xf32>
      tpu.vector_store %arg17[%c0_90, %c0_91], %216 {strides = array<i32>} : memref<16x32xf32, #tpu.memory_space<vmem>>, vector<16x32xf32>,
      %cst_92 = arith.constant 0.000000e+00 : f32
      %218 = vector.broadcast %cst_92 : f32 to vector<2x1xf32>
      %c0_93 = arith.constant 0 : index
      %c0_94 = arith.constant 0 : index
      %219 = vector.load %arg16[%c0_93, %c0_94] : memref<2x1xf32, #tpu.memory_space<vmem>>, vector<2x1xf32>
      tpu.vector_store %arg16[%c0_93, %c0_94], %218 {strides = array<i32>} : memref<2x1xf32, #tpu.memory_space<vmem>>, vector<2x1xf32>,
    } else {
    }
    %c0 = arith.constant 0 : index
    %c0_1 = arith.constant 0 : index
    %3 = vector.load %arg17[%c0, %c0_1] : memref<16x32xf32, #tpu.memory_space<vmem>>, vector<16x32xf32>
    %c0_2 = arith.constant 0 : index
    %c0_3 = arith.constant 0 : index
    %c0_4 = arith.constant 0 : index
    %4 = vector.load %arg2[%c0_2, %c0_3, %c0_4] : memref<1x32x96xf32, #tpu.memory_space<vmem>>, vector<1x32x96xf32>
    %5 = vector.shape_cast %4 : vector<1x32x96xf32> to vector<32x96xf32>
    %cst = arith.constant dense<0.000000e+00> : vector<16x96xf32>
    %6 = tpu.matmul %3, %5, %cst {dimension_numbers = #tpu.dot_dimension_numbers<[1], [0], [0], [1], [0, 0, 1, 1], [], []>} : vector<16x32xf32>, vector<32x96xf32>, vector<16x96xf32> -> vector<16x96xf32>
    %c0_5 = arith.constant 0 : index
    %c0_6 = arith.constant 0 : index
    %c0_7 = arith.constant 0 : index
    %7 = vector.load %arg3[%c0_5, %c0_6, %c0_7] : memref<1x1x96xf32, #tpu.memory_space<vmem>>, vector<1x1x96xf32>
    %8 = vector.shape_cast %7 : vector<1x1x96xf32> to vector<1x96xf32>
    %9 = vector.broadcast %8 : vector<1x96xf32> to vector<16x96xf32>
    %10 = arith.addf %6, %9 : vector<16x96xf32>
    %11 = vector.extract_strided_slice %10 {offsets = [0, 0], sizes = [8, 8], strides = [1, 1]} : vector<16x96xf32> to vector<8x8xf32>
    %12 = vector.extract_strided_slice %10 {offsets = [0, 32], sizes = [8, 8], strides = [1, 1]} : vector<16x96xf32> to vector<8x8xf32>
    %13 = vector.extract_strided_slice %10 {offsets = [0, 64], sizes = [8, 8], strides = [1, 1]} : vector<16x96xf32> to vector<8x8xf32>
    %cst_8 = arith.constant dense<0.000000e+00> : vector<8x8xf32>
    %14 = tpu.matmul %11, %12, %cst_8 {dimension_numbers = #tpu.dot_dimension_numbers<[1], [1], [0], [0], [0, 0, 1, 0], [], []>} : vector<8x8xf32>, vector<8x8xf32>, vector<8x8xf32> -> vector<8x8xf32>
    %cst_9 = arith.constant dense<0xFF800000> : vector<8xf32>
    %15 = vector.multi_reduction <maximumf>, %14, %cst_9 [1] : vector<8x8xf32> to vector<8xf32>
    %16 = vector.shape_cast %15 : vector<8xf32> to vector<8x1xf32>
    %17 = vector.broadcast %16 : vector<8x1xf32> to vector<8x8xf32>
    %18 = arith.subf %14, %17 : vector<8x8xf32>
    %19 = math.exp %18 : vector<8x8xf32>
    %cst_10 = arith.constant dense<0.000000e+00> : vector<8xf32>
    %20 = vector.multi_reduction <add>, %19, %cst_10 [1] : vector<8x8xf32> to vector<8xf32>
    %21 = vector.shape_cast %20 : vector<8xf32> to vector<8x1xf32>
    %22 = tpu.reciprocal %21 {approx = true} : vector<8x1xf32> -> vector<8x1xf32>
    %23 = vector.broadcast %22 : vector<8x1xf32> to vector<8x8xf32>
    %24 = arith.mulf %19, %23 : vector<8x8xf32>
    %cst_11 = arith.constant dense<0.000000e+00> : vector<8x8xf32>
    %25 = tpu.matmul %24, %13, %cst_11 {dimension_numbers = #tpu.dot_dimension_numbers<[1], [0], [0], [1], [0, 0, 1, 1], [], []>} : vector<8x8xf32>, vector<8x8xf32>, vector<8x8xf32> -> vector<8x8xf32>
    %26 = vector.extract_strided_slice %10 {offsets = [0, 8], sizes = [8, 8], strides = [1, 1]} : vector<16x96xf32> to vector<8x8xf32>
    %27 = vector.extract_strided_slice %10 {offsets = [0, 40], sizes = [8, 8], strides = [1, 1]} : vector<16x96xf32> to vector<8x8xf32>
    %28 = vector.extract_strided_slice %10 {offsets = [0, 72], sizes = [8, 8], strides = [1, 1]} : vector<16x96xf32> to vector<8x8xf32>
    %cst_12 = arith.constant dense<0.000000e+00> : vector<8x8xf32>
    %29 = tpu.matmul %26, %27, %cst_12 {dimension_numbers = #tpu.dot_dimension_numbers<[1], [1], [0], [0], [0, 0, 1, 0], [], []>} : vector<8x8xf32>, vector<8x8xf32>, vector<8x8xf32> -> vector<8x8xf32>
    %cst_13 = arith.constant dense<0xFF800000> : vector<8xf32>
    %30 = vector.multi_reduction <maximumf>, %29, %cst_13 [1] : vector<8x8xf32> to vector<8xf32>
    %31 = vector.shape_cast %30 : vector<8xf32> to vector<8x1xf32>
    %32 = vector.broadcast %31 : vector<8x1xf32> to vector<8x8xf32>
    %33 = arith.subf %29, %32 : vector<8x8xf32>
    %34 = math.exp %33 : vector<8x8xf32>
    %cst_14 = arith.constant dense<0.000000e+00> : vector<8xf32>
    %35 = vector.multi_reduction <add>, %34, %cst_14 [1] : vector<8x8xf32> to vector<8xf32>
    %36 = vector.shape_cast %35 : vector<8xf32> to vector<8x1xf32>
    %37 = tpu.reciprocal %36 {approx = true} : vector<8x1xf32> -> vector<8x1xf32>
    %38 = vector.broadcast %37 : vector<8x1xf32> to vector<8x8xf32>
    %39 = arith.mulf %34, %38 : vector<8x8xf32>
    %cst_15 = arith.constant dense<0.000000e+00> : vector<8x8xf32>
    %40 = tpu.matmul %39, %28, %cst_15 {dimension_numbers = #tpu.dot_dimension_numbers<[1], [0], [0], [1], [0, 0, 1, 1], [], []>} : vector<8x8xf32>, vector<8x8xf32>, vector<8x8xf32> -> vector<8x8xf32>
    %41 = vector.extract_strided_slice %10 {offsets = [0, 16], sizes = [8, 8], strides = [1, 1]} : vector<16x96xf32> to vector<8x8xf32>
    %42 = vector.extract_strided_slice %10 {offsets = [0, 48], sizes = [8, 8], strides = [1, 1]} : vector<16x96xf32> to vector<8x8xf32>
    %43 = vector.extract_strided_slice %10 {offsets = [0, 80], sizes = [8, 8], strides = [1, 1]} : vector<16x96xf32> to vector<8x8xf32>
    %cst_16 = arith.constant dense<0.000000e+00> : vector<8x8xf32>
    %44 = tpu.matmul %41, %42, %cst_16 {dimension_numbers = #tpu.dot_dimension_numbers<[1], [1], [0], [0], [0, 0, 1, 0], [], []>} : vector<8x8xf32>, vector<8x8xf32>, vector<8x8xf32> -> vector<8x8xf32>
    %cst_17 = arith.constant dense<0xFF800000> : vector<8xf32>
    %45 = vector.multi_reduction <maximumf>, %44, %cst_17 [1] : vector<8x8xf32> to vector<8xf32>
    %46 = vector.shape_cast %45 : vector<8xf32> to vector<8x1xf32>
    %47 = vector.broadcast %46 : vector<8x1xf32> to vector<8x8xf32>
    %48 = arith.subf %44, %47 : vector<8x8xf32>
    %49 = math.exp %48 : vector<8x8xf32>
    %cst_18 = arith.constant dense<0.000000e+00> : vector<8xf32>
    %50 = vector.multi_reduction <add>, %49, %cst_18 [1] : vector<8x8xf32> to vector<8xf32>
    %51 = vector.shape_cast %50 : vector<8xf32> to vector<8x1xf32>
    %52 = tpu.reciprocal %51 {approx = true} : vector<8x1xf32> -> vector<8x1xf32>
    %53 = vector.broadcast %52 : vector<8x1xf32> to vector<8x8xf32>
    %54 = arith.mulf %49, %53 : vector<8x8xf32>
    %cst_19 = arith.constant dense<0.000000e+00> : vector<8x8xf32>
    %55 = tpu.matmul %54, %43, %cst_19 {dimension_numbers = #tpu.dot_dimension_numbers<[1], [0], [0], [1], [0, 0, 1, 1], [], []>} : vector<8x8xf32>, vector<8x8xf32>, vector<8x8xf32> -> vector<8x8xf32>
    %56 = vector.extract_strided_slice %10 {offsets = [0, 24], sizes = [8, 8], strides = [1, 1]} : vector<16x96xf32> to vector<8x8xf32>
    %57 = vector.extract_strided_slice %10 {offsets = [0, 56], sizes = [8, 8], strides = [1, 1]} : vector<16x96xf32> to vector<8x8xf32>
    %58 = vector.extract_strided_slice %10 {offsets = [0, 88], sizes = [8, 8], strides = [1, 1]} : vector<16x96xf32> to vector<8x8xf32>
    %cst_20 = arith.constant dense<0.000000e+00> : vector<8x8xf32>
    %59 = tpu.matmul %56, %57, %cst_20 {dimension_numbers = #tpu.dot_dimension_numbers<[1], [1], [0], [0], [0, 0, 1, 0], [], []>} : vector<8x8xf32>, vector<8x8xf32>, vector<8x8xf32> -> vector<8x8xf32>
    %cst_21 = arith.constant dense<0xFF800000> : vector<8xf32>
    %60 = vector.multi_reduction <maximumf>, %59, %cst_21 [1] : vector<8x8xf32> to vector<8xf32>
    %61 = vector.shape_cast %60 : vector<8xf32> to vector<8x1xf32>
    %62 = vector.broadcast %61 : vector<8x1xf32> to vector<8x8xf32>
    %63 = arith.subf %59, %62 : vector<8x8xf32>
    %64 = math.exp %63 : vector<8x8xf32>
    %cst_22 = arith.constant dense<0.000000e+00> : vector<8xf32>
    %65 = vector.multi_reduction <add>, %64, %cst_22 [1] : vector<8x8xf32> to vector<8xf32>
    %66 = vector.shape_cast %65 : vector<8xf32> to vector<8x1xf32>
    %67 = tpu.reciprocal %66 {approx = true} : vector<8x1xf32> -> vector<8x1xf32>
    %68 = vector.broadcast %67 : vector<8x1xf32> to vector<8x8xf32>
    %69 = arith.mulf %64, %68 : vector<8x8xf32>
    %cst_23 = arith.constant dense<0.000000e+00> : vector<8x8xf32>
    %70 = tpu.matmul %69, %58, %cst_23 {dimension_numbers = #tpu.dot_dimension_numbers<[1], [0], [0], [1], [0, 0, 1, 1], [], []>} : vector<8x8xf32>, vector<8x8xf32>, vector<8x8xf32> -> vector<8x8xf32>
    %71 = tpu.concatenate %25, %40, %55, %70 in 1 : vector<8x8xf32>, vector<8x8xf32>, vector<8x8xf32>, vector<8x8xf32> -> vector<8x32xf32>
    %72 = vector.extract_strided_slice %10 {offsets = [8, 0], sizes = [8, 8], strides = [1, 1]} : vector<16x96xf32> to vector<8x8xf32>
    %73 = vector.extract_strided_slice %10 {offsets = [8, 32], sizes = [8, 8], strides = [1, 1]} : vector<16x96xf32> to vector<8x8xf32>
    %74 = vector.extract_strided_slice %10 {offsets = [8, 64], sizes = [8, 8], strides = [1, 1]} : vector<16x96xf32> to vector<8x8xf32>
    %cst_24 = arith.constant dense<0.000000e+00> : vector<8x8xf32>
    %75 = tpu.matmul %72, %73, %cst_24 {dimension_numbers = #tpu.dot_dimension_numbers<[1], [1], [0], [0], [0, 0, 1, 0], [], []>} : vector<8x8xf32>, vector<8x8xf32>, vector<8x8xf32> -> vector<8x8xf32>
    %cst_25 = arith.constant dense<0xFF800000> : vector<8xf32>
    %76 = vector.multi_reduction <maximumf>, %75, %cst_25 [1] : vector<8x8xf32> to vector<8xf32>
    %77 = vector.shape_cast %76 : vector<8xf32> to vector<8x1xf32>
    %78 = vector.broadcast %77 : vector<8x1xf32> to vector<8x8xf32>
    %79 = arith.subf %75, %78 : vector<8x8xf32>
    %80 = math.exp %79 : vector<8x8xf32>
    %cst_26 = arith.constant dense<0.000000e+00> : vector<8xf32>
    %81 = vector.multi_reduction <add>, %80, %cst_26 [1] : vector<8x8xf32> to vector<8xf32>
    %82 = vector.shape_cast %81 : vector<8xf32> to vector<8x1xf32>
    %83 = tpu.reciprocal %82 {approx = true} : vector<8x1xf32> -> vector<8x1xf32>
    %84 = vector.broadcast %83 : vector<8x1xf32> to vector<8x8xf32>
    %85 = arith.mulf %80, %84 : vector<8x8xf32>
    %cst_27 = arith.constant dense<0.000000e+00> : vector<8x8xf32>
    %86 = tpu.matmul %85, %74, %cst_27 {dimension_numbers = #tpu.dot_dimension_numbers<[1], [0], [0], [1], [0, 0, 1, 1], [], []>} : vector<8x8xf32>, vector<8x8xf32>, vector<8x8xf32> -> vector<8x8xf32>
    %87 = vector.extract_strided_slice %10 {offsets = [8, 8], sizes = [8, 8], strides = [1, 1]} : vector<16x96xf32> to vector<8x8xf32>
    %88 = vector.extract_strided_slice %10 {offsets = [8, 40], sizes = [8, 8], strides = [1, 1]} : vector<16x96xf32> to vector<8x8xf32>
    %89 = vector.extract_strided_slice %10 {offsets = [8, 72], sizes = [8, 8], strides = [1, 1]} : vector<16x96xf32> to vector<8x8xf32>
    %cst_28 = arith.constant dense<0.000000e+00> : vector<8x8xf32>
    %90 = tpu.matmul %87, %88, %cst_28 {dimension_numbers = #tpu.dot_dimension_numbers<[1], [1], [0], [0], [0, 0, 1, 0], [], []>} : vector<8x8xf32>, vector<8x8xf32>, vector<8x8xf32> -> vector<8x8xf32>
    %cst_29 = arith.constant dense<0xFF800000> : vector<8xf32>
    %91 = vector.multi_reduction <maximumf>, %90, %cst_29 [1] : vector<8x8xf32> to vector<8xf32>
    %92 = vector.shape_cast %91 : vector<8xf32> to vector<8x1xf32>
    %93 = vector.broadcast %92 : vector<8x1xf32> to vector<8x8xf32>
    %94 = arith.subf %90, %93 : vector<8x8xf32>
    %95 = math.exp %94 : vector<8x8xf32>
    %cst_30 = arith.constant dense<0.000000e+00> : vector<8xf32>
    %96 = vector.multi_reduction <add>, %95, %cst_30 [1] : vector<8x8xf32> to vector<8xf32>
    %97 = vector.shape_cast %96 : vector<8xf32> to vector<8x1xf32>
    %98 = tpu.reciprocal %97 {approx = true} : vector<8x1xf32> -> vector<8x1xf32>
    %99 = vector.broadcast %98 : vector<8x1xf32> to vector<8x8xf32>
    %100 = arith.mulf %95, %99 : vector<8x8xf32>
    %cst_31 = arith.constant dense<0.000000e+00> : vector<8x8xf32>
    %101 = tpu.matmul %100, %89, %cst_31 {dimension_numbers = #tpu.dot_dimension_numbers<[1], [0], [0], [1], [0, 0, 1, 1], [], []>} : vector<8x8xf32>, vector<8x8xf32>, vector<8x8xf32> -> vector<8x8xf32>
    %102 = vector.extract_strided_slice %10 {offsets = [8, 16], sizes = [8, 8], strides = [1, 1]} : vector<16x96xf32> to vector<8x8xf32>
    %103 = vector.extract_strided_slice %10 {offsets = [8, 48], sizes = [8, 8], strides = [1, 1]} : vector<16x96xf32> to vector<8x8xf32>
    %104 = vector.extract_strided_slice %10 {offsets = [8, 80], sizes = [8, 8], strides = [1, 1]} : vector<16x96xf32> to vector<8x8xf32>
    %cst_32 = arith.constant dense<0.000000e+00> : vector<8x8xf32>
    %105 = tpu.matmul %102, %103, %cst_32 {dimension_numbers = #tpu.dot_dimension_numbers<[1], [1], [0], [0], [0, 0, 1, 0], [], []>} : vector<8x8xf32>, vector<8x8xf32>, vector<8x8xf32> -> vector<8x8xf32>
    %cst_33 = arith.constant dense<0xFF800000> : vector<8xf32>
    %106 = vector.multi_reduction <maximumf>, %105, %cst_33 [1] : vector<8x8xf32> to vector<8xf32>
    %107 = vector.shape_cast %106 : vector<8xf32> to vector<8x1xf32>
    %108 = vector.broadcast %107 : vector<8x1xf32> to vector<8x8xf32>
    %109 = arith.subf %105, %108 : vector<8x8xf32>
    %110 = math.exp %109 : vector<8x8xf32>
    %cst_34 = arith.constant dense<0.000000e+00> : vector<8xf32>
    %111 = vector.multi_reduction <add>, %110, %cst_34 [1] : vector<8x8xf32> to vector<8xf32>
    %112 = vector.shape_cast %111 : vector<8xf32> to vector<8x1xf32>
    %113 = tpu.reciprocal %112 {approx = true} : vector<8x1xf32> -> vector<8x1xf32>
    %114 = vector.broadcast %113 : vector<8x1xf32> to vector<8x8xf32>
    %115 = arith.mulf %110, %114 : vector<8x8xf32>
    %cst_35 = arith.constant dense<0.000000e+00> : vector<8x8xf32>
    %116 = tpu.matmul %115, %104, %cst_35 {dimension_numbers = #tpu.dot_dimension_numbers<[1], [0], [0], [1], [0, 0, 1, 1], [], []>} : vector<8x8xf32>, vector<8x8xf32>, vector<8x8xf32> -> vector<8x8xf32>
    %117 = vector.extract_strided_slice %10 {offsets = [8, 24], sizes = [8, 8], strides = [1, 1]} : vector<16x96xf32> to vector<8x8xf32>
    %118 = vector.extract_strided_slice %10 {offsets = [8, 56], sizes = [8, 8], strides = [1, 1]} : vector<16x96xf32> to vector<8x8xf32>
    %119 = vector.extract_strided_slice %10 {offsets = [8, 88], sizes = [8, 8], strides = [1, 1]} : vector<16x96xf32> to vector<8x8xf32>
    %cst_36 = arith.constant dense<0.000000e+00> : vector<8x8xf32>
    %120 = tpu.matmul %117, %118, %cst_36 {dimension_numbers = #tpu.dot_dimension_numbers<[1], [1], [0], [0], [0, 0, 1, 0], [], []>} : vector<8x8xf32>, vector<8x8xf32>, vector<8x8xf32> -> vector<8x8xf32>
    %cst_37 = arith.constant dense<0xFF800000> : vector<8xf32>
    %121 = vector.multi_reduction <maximumf>, %120, %cst_37 [1] : vector<8x8xf32> to vector<8xf32>
    %122 = vector.shape_cast %121 : vector<8xf32> to vector<8x1xf32>
    %123 = vector.broadcast %122 : vector<8x1xf32> to vector<8x8xf32>
    %124 = arith.subf %120, %123 : vector<8x8xf32>
    %125 = math.exp %124 : vector<8x8xf32>
    %cst_38 = arith.constant dense<0.000000e+00> : vector<8xf32>
    %126 = vector.multi_reduction <add>, %125, %cst_38 [1] : vector<8x8xf32> to vector<8xf32>
    %127 = vector.shape_cast %126 : vector<8xf32> to vector<8x1xf32>
    %128 = tpu.reciprocal %127 {approx = true} : vector<8x1xf32> -> vector<8x1xf32>
    %129 = vector.broadcast %128 : vector<8x1xf32> to vector<8x8xf32>
    %130 = arith.mulf %125, %129 : vector<8x8xf32>
    %cst_39 = arith.constant dense<0.000000e+00> : vector<8x8xf32>
    %131 = tpu.matmul %130, %119, %cst_39 {dimension_numbers = #tpu.dot_dimension_numbers<[1], [0], [0], [1], [0, 0, 1, 1], [], []>} : vector<8x8xf32>, vector<8x8xf32>, vector<8x8xf32> -> vector<8x8xf32>
    %132 = tpu.concatenate %86, %101, %116, %131 in 1 : vector<8x8xf32>, vector<8x8xf32>, vector<8x8xf32>, vector<8x8xf32> -> vector<8x32xf32>
    %133 = tpu.concatenate %71, %132 in 0 : vector<8x32xf32>, vector<8x32xf32> -> vector<16x32xf32>
    %c0_40 = arith.constant 0 : index
    %c0_41 = arith.constant 0 : index
    %c0_42 = arith.constant 0 : index
    %134 = vector.load %arg4[%c0_40, %c0_41, %c0_42] : memref<1x32x32xf32, #tpu.memory_space<vmem>>, vector<1x32x32xf32>
    %135 = vector.shape_cast %134 : vector<1x32x32xf32> to vector<32x32xf32>
    %cst_43 = arith.constant dense<0.000000e+00> : vector<16x32xf32>
    %136 = tpu.matmul %133, %135, %cst_43 {dimension_numbers = #tpu.dot_dimension_numbers<[1], [0], [0], [1], [0, 0, 1, 1], [], []>} : vector<16x32xf32>, vector<32x32xf32>, vector<16x32xf32> -> vector<16x32xf32>
    %c0_44 = arith.constant 0 : index
    %c0_45 = arith.constant 0 : index
    %c0_46 = arith.constant 0 : index
    %137 = vector.load %arg5[%c0_44, %c0_45, %c0_46] : memref<1x1x32xf32, #tpu.memory_space<vmem>>, vector<1x1x32xf32>
    %138 = vector.shape_cast %137 : vector<1x1x32xf32> to vector<1x32xf32>
    %139 = vector.broadcast %138 : vector<1x32xf32> to vector<16x32xf32>
    %140 = arith.addf %136, %139 : vector<16x32xf32>
    %141 = arith.addf %3, %140 : vector<16x32xf32>
    %cst_47 = arith.constant dense<0.000000e+00> : vector<16xf32>
    %142 = vector.multi_reduction <add>, %141, %cst_47 [1] : vector<16x32xf32> to vector<16xf32>
    %143 = vector.shape_cast %142 : vector<16xf32> to vector<16x1xf32>
    %cst_48 = arith.constant 3.200000e+01 : f32
    %144 = vector.broadcast %cst_48 : f32 to vector<16x1xf32>
    %145 = arith.divf %143, %144 : vector<16x1xf32>
    %146 = vector.broadcast %145 : vector<16x1xf32> to vector<16x32xf32>
    %147 = arith.subf %141, %146 : vector<16x32xf32>
    %148 = arith.mulf %147, %147 : vector<16x32xf32>
    %cst_49 = arith.constant dense<0.000000e+00> : vector<16xf32>
    %149 = vector.multi_reduction <add>, %148, %cst_49 [1] : vector<16x32xf32> to vector<16xf32>
    %150 = vector.shape_cast %149 : vector<16xf32> to vector<16x1xf32>
    %cst_50 = arith.constant 3.200000e+01 : f32
    %151 = vector.broadcast %cst_50 : f32 to vector<16x1xf32>
    %152 = arith.divf %150, %151 : vector<16x1xf32>
    %153 = vector.broadcast %145 : vector<16x1xf32> to vector<16x32xf32>
    %154 = arith.subf %141, %153 : vector<16x32xf32>
    %cst_51 = arith.constant 9.99999974E-6 : f32
    %155 = vector.broadcast %cst_51 : f32 to vector<16x1xf32>
    %156 = arith.addf %152, %155 : vector<16x1xf32>
    %157 = math.rsqrt %156 : vector<16x1xf32>
    %158 = vector.broadcast %157 : vector<16x1xf32> to vector<16x32xf32>
    %159 = arith.mulf %154, %158 : vector<16x32xf32>
    %c0_52 = arith.constant 0 : index
    %c0_53 = arith.constant 0 : index
    %c0_54 = arith.constant 0 : index
    %160 = vector.load %arg10[%c0_52, %c0_53, %c0_54] : memref<1x1x32xf32, #tpu.memory_space<vmem>>, vector<1x1x32xf32>
    %161 = vector.shape_cast %160 : vector<1x1x32xf32> to vector<1x32xf32>
    %162 = vector.broadcast %161 : vector<1x32xf32> to vector<16x32xf32>
    %163 = arith.mulf %159, %162 : vector<16x32xf32>
    %c0_55 = arith.constant 0 : index
    %c0_56 = arith.constant 0 : index
    %c0_57 = arith.constant 0 : index
    %164 = vector.load %arg11[%c0_55, %c0_56, %c0_57] : memref<1x1x32xf32, #tpu.memory_space<vmem>>, vector<1x1x32xf32>
    %165 = vector.shape_cast %164 : vector<1x1x32xf32> to vector<1x32xf32>
    %166 = vector.broadcast %165 : vector<1x32xf32> to vector<16x32xf32>
    %167 = arith.addf %163, %166 : vector<16x32xf32>
    %c0_58 = arith.constant 0 : index
    %c0_59 = arith.constant 0 : index
    %c0_60 = arith.constant 0 : index
    %168 = vector.load %arg6[%c0_58, %c0_59, %c0_60] : memref<1x32x128xf32, #tpu.memory_space<vmem>>, vector<1x32x128xf32>
    %169 = vector.shape_cast %168 : vector<1x32x128xf32> to vector<32x128xf32>
    %cst_61 = arith.constant dense<0.000000e+00> : vector<16x128xf32>
    %170 = tpu.matmul %167, %169, %cst_61 {dimension_numbers = #tpu.dot_dimension_numbers<[1], [0], [0], [1], [0, 0, 1, 1], [], []>} : vector<16x32xf32>, vector<32x128xf32>, vector<16x128xf32> -> vector<16x128xf32>
    %c0_62 = arith.constant 0 : index
    %c0_63 = arith.constant 0 : index
    %c0_64 = arith.constant 0 : index
    %171 = vector.load %arg7[%c0_62, %c0_63, %c0_64] : memref<1x1x128xf32, #tpu.memory_space<vmem>>, vector<1x1x128xf32>
    %172 = vector.shape_cast %171 : vector<1x1x128xf32> to vector<1x128xf32>
    %173 = vector.broadcast %172 : vector<1x128xf32> to vector<16x128xf32>
    %174 = arith.addf %170, %173 : vector<16x128xf32>
    %cst_65 = arith.constant 0.000000e+00 : f32
    %175 = vector.broadcast %cst_65 : f32 to vector<16x128xf32>
    %176 = arith.maximumf %174, %175 : vector<16x128xf32>
    %c0_66 = arith.constant 0 : index
    %c0_67 = arith.constant 0 : index
    %c0_68 = arith.constant 0 : index
    %177 = vector.load %arg8[%c0_66, %c0_67, %c0_68] : memref<1x128x32xf32, #tpu.memory_space<vmem>>, vector<1x128x32xf32>
    %178 = vector.shape_cast %177 : vector<1x128x32xf32> to vector<128x32xf32>
    %cst_69 = arith.constant dense<0.000000e+00> : vector<16x32xf32>
    %179 = tpu.matmul %176, %178, %cst_69 {dimension_numbers = #tpu.dot_dimension_numbers<[1], [0], [0], [1], [0, 0, 1, 1], [], []>} : vector<16x128xf32>, vector<128x32xf32>, vector<16x32xf32> -> vector<16x32xf32>
    %c0_70 = arith.constant 0 : index
    %c0_71 = arith.constant 0 : index
    %c0_72 = arith.constant 0 : index
    %180 = vector.load %arg9[%c0_70, %c0_71, %c0_72] : memref<1x1x32xf32, #tpu.memory_space<vmem>>, vector<1x1x32xf32>
    %181 = vector.shape_cast %180 : vector<1x1x32xf32> to vector<1x32xf32>
    %182 = vector.broadcast %181 : vector<1x32xf32> to vector<16x32xf32>
    %183 = arith.addf %179, %182 : vector<16x32xf32>
    %184 = arith.addf %167, %183 : vector<16x32xf32>
    %cst_73 = arith.constant dense<0.000000e+00> : vector<16xf32>
    %185 = vector.multi_reduction <add>, %184, %cst_73 [1] : vector<16x32xf32> to vector<16xf32>
    %186 = vector.shape_cast %185 : vector<16xf32> to vector<16x1xf32>
    %cst_74 = arith.constant 3.200000e+01 : f32
    %187 = vector.broadcast %cst_74 : f32 to vector<16x1xf32>
    %188 = arith.divf %186, %187 : vector<16x1xf32>
    %189 = vector.broadcast %188 : vector<16x1xf32> to vector<16x32xf32>
    %190 = arith.subf %184, %189 : vector<16x32xf32>
    %191 = arith.mulf %190, %190 : vector<16x32xf32>
    %cst_75 = arith.constant dense<0.000000e+00> : vector<16xf32>
    %192 = vector.multi_reduction <add>, %191, %cst_75 [1] : vector<16x32xf32> to vector<16xf32>
    %193 = vector.shape_cast %192 : vector<16xf32> to vector<16x1xf32>
    %cst_76 = arith.constant 3.200000e+01 : f32
    %194 = vector.broadcast %cst_76 : f32 to vector<16x1xf32>
    %195 = arith.divf %193, %194 : vector<16x1xf32>
    %196 = vector.broadcast %188 : vector<16x1xf32> to vector<16x32xf32>
    %197 = arith.subf %184, %196 : vector<16x32xf32>
    %cst_77 = arith.constant 9.99999974E-6 : f32
    %198 = vector.broadcast %cst_77 : f32 to vector<16x1xf32>
    %199 = arith.addf %195, %198 : vector<16x1xf32>
    %200 = math.rsqrt %199 : vector<16x1xf32>
    %201 = vector.broadcast %200 : vector<16x1xf32> to vector<16x32xf32>
    %202 = arith.mulf %197, %201 : vector<16x32xf32>
    %c0_78 = arith.constant 0 : index
    %c0_79 = arith.constant 0 : index
    %c0_80 = arith.constant 0 : index
    %203 = vector.load %arg12[%c0_78, %c0_79, %c0_80] : memref<1x1x32xf32, #tpu.memory_space<vmem>>, vector<1x1x32xf32>
    %204 = vector.shape_cast %203 : vector<1x1x32xf32> to vector<1x32xf32>
    %205 = vector.broadcast %204 : vector<1x32xf32> to vector<16x32xf32>
    %206 = arith.mulf %202, %205 : vector<16x32xf32>
    %c0_81 = arith.constant 0 : index
    %c0_82 = arith.constant 0 : index
    %c0_83 = arith.constant 0 : index
    %207 = vector.load %arg13[%c0_81, %c0_82, %c0_83] : memref<1x1x32xf32, #tpu.memory_space<vmem>>, vector<1x1x32xf32>
    %208 = vector.shape_cast %207 : vector<1x1x32xf32> to vector<1x32xf32>
    %209 = vector.broadcast %208 : vector<1x32xf32> to vector<16x32xf32>
    %210 = arith.addf %206, %209 : vector<16x32xf32>
    %c0_84 = arith.constant 0 : index
    %c0_85 = arith.constant 0 : index
    %211 = vector.load %arg17[%c0_84, %c0_85] : memref<16x32xf32, #tpu.memory_space<vmem>>, vector<16x32xf32>
    tpu.vector_store %arg17[%c0_84, %c0_85], %210 {strides = array<i32>} : memref<16x32xf32, #tpu.memory_space<vmem>>, vector<16x32xf32>,
    %c1_i32 = arith.constant 1 : i32
    %212 = arith.cmpi eq, %arg0, %c1_i32 : i32
    %213 = arith.extui %212 : i1 to i32
    %c0_i32_86 = arith.constant 0 : i32
    %214 = arith.cmpi ne, %213, %c0_i32_86 : i32
    scf.if %214 {
      %215 = vector.extract_strided_slice %210 {offsets = [7, 0], sizes = [1, 32], strides = [1, 1]} : vector<16x32xf32> to vector<1x32xf32>
      %216 = vector.extract_strided_slice %210 {offsets = [15, 0], sizes = [1, 32], strides = [1, 1]} : vector<16x32xf32> to vector<1x32xf32>
      %217 = tpu.concatenate %215, %216 in 0 : vector<1x32xf32>, vector<1x32xf32> -> vector<2x32xf32>
      %c0_87 = arith.constant 0 : index
      %c0_88 = arith.constant 0 : index
      %218 = vector.load %arg14[%c0_87, %c0_88] : memref<1x32xf32, #tpu.memory_space<vmem>>, vector<1x32xf32>
      %219 = vector.broadcast %218 : vector<1x32xf32> to vector<2x32xf32>
      %220 = arith.mulf %217, %219 : vector<2x32xf32>
      %cst_89 = arith.constant dense<0.000000e+00> : vector<2xf32>
      %221 = vector.multi_reduction <add>, %220, %cst_89 [1] : vector<2x32xf32> to vector<2xf32>
      %222 = vector.shape_cast %221 : vector<2xf32> to vector<2x1xf32>
      %c0_90 = arith.constant 0 : index
      %c0_91 = arith.constant 0 : index
      %223 = vector.load %arg15[%c0_90, %c0_91] : memref<1x1xf32, #tpu.memory_space<vmem>>, vector<1x1xf32>
      %224 = vector.broadcast %223 : vector<1x1xf32> to vector<2x1xf32>
      %225 = arith.addf %222, %224 : vector<2x1xf32>
      %c0_92 = arith.constant 0 : index
      %c0_93 = arith.constant 0 : index
      %226 = vector.load %arg16[%c0_92, %c0_93] : memref<2x1xf32, #tpu.memory_space<vmem>>, vector<2x1xf32>
      tpu.vector_store %arg16[%c0_92, %c0_93], %225 {strides = array<i32>} : memref<2x1xf32, #tpu.memory_space<vmem>>, vector<2x1xf32>,
    } else {
    }
    return
  }
  func.func @transform_0(%arg0: i32) -> (i32, i32, i32) {
    %c0_i32 = arith.constant 0 : i32
    %c0_i32_0 = arith.constant 0 : i32
    %c0_i32_1 = arith.constant 0 : i32
    %c0_i32_2 = arith.constant 0 : i32
    return %c0_i32, %c0_i32_0, %c0_i32_1 : i32, i32, i32
  }
  func.func @transform_1(%arg0: i32) -> (i32, i32, i32) {
    %c0_i32 = arith.constant 0 : i32
    %c0_i32_0 = arith.constant 0 : i32
    %c0_i32_1 = arith.constant 0 : i32
    return %arg0, %c0_i32, %c0_i32_0 : i32, i32, i32
  }
  func.func @transform_2(%arg0: i32) -> (i32, i32, i32) {
    %c0_i32 = arith.constant 0 : i32
    %c0_i32_0 = arith.constant 0 : i32
    %c0_i32_1 = arith.constant 0 : i32
    return %arg0, %c0_i32, %c0_i32_0 : i32, i32, i32
  }
  func.func @transform_3(%arg0: i32) -> (i32, i32, i32) {
    %c0_i32 = arith.constant 0 : i32
    %c0_i32_0 = arith.constant 0 : i32
    %c0_i32_1 = arith.constant 0 : i32
    return %arg0, %c0_i32, %c0_i32_0 : i32, i32, i32
  }
  func.func @transform_4(%arg0: i32) -> (i32, i32, i32) {
    %c0_i32 = arith.constant 0 : i32
    %c0_i32_0 = arith.constant 0 : i32
    %c0_i32_1 = arith.constant 0 : i32
    return %arg0, %c0_i32, %c0_i32_0 : i32, i32, i32
  }
  func.func @transform_5(%arg0: i32) -> (i32, i32, i32) {
    %c0_i32 = arith.constant 0 : i32
    %c0_i32_0 = arith.constant 0 : i32
    %c0_i32_1 = arith.constant 0 : i32
    return %arg0, %c0_i32, %c0_i32_0 : i32, i32, i32
  }
  func.func @transform_6(%arg0: i32) -> (i32, i32, i32) {
    %c0_i32 = arith.constant 0 : i32
    %c0_i32_0 = arith.constant 0 : i32
    %c0_i32_1 = arith.constant 0 : i32
    return %arg0, %c0_i32, %c0_i32_0 : i32, i32, i32
  }
  func.func @transform_7(%arg0: i32) -> (i32, i32, i32) {
    %c0_i32 = arith.constant 0 : i32
    %c0_i32_0 = arith.constant 0 : i32
    %c0_i32_1 = arith.constant 0 : i32
    return %arg0, %c0_i32, %c0_i32_0 : i32, i32, i32
  }
  func.func @transform_8(%arg0: i32) -> (i32, i32, i32) {
    %c0_i32 = arith.constant 0 : i32
    %c0_i32_0 = arith.constant 0 : i32
    %c0_i32_1 = arith.constant 0 : i32
    return %arg0, %c0_i32, %c0_i32_0 : i32, i32, i32
  }
  func.func @transform_9(%arg0: i32) -> (i32, i32, i32) {
    %c0_i32 = arith.constant 0 : i32
    %c0_i32_0 = arith.constant 0 : i32
    %c0_i32_1 = arith.constant 0 : i32
    return %arg0, %c0_i32, %c0_i32_0 : i32, i32, i32
  }
  func.func @transform_10(%arg0: i32) -> (i32, i32, i32) {
    %c0_i32 = arith.constant 0 : i32
    %c0_i32_0 = arith.constant 0 : i32
    %c0_i32_1 = arith.constant 0 : i32
    return %arg0, %c0_i32, %c0_i32_0 : i32, i32, i32
  }
  func.func @transform_11(%arg0: i32) -> (i32, i32, i32) {
    %c0_i32 = arith.constant 0 : i32
    %c0_i32_0 = arith.constant 0 : i32
    %c0_i32_1 = arith.constant 0 : i32
    return %arg0, %c0_i32, %c0_i32_0 : i32, i32, i32
  }
  func.func @transform_12(%arg0: i32) -> (i32, i32, i32) {
    %c0_i32 = arith.constant 0 : i32
    %c0_i32_0 = arith.constant 0 : i32
    %c0_i32_1 = arith.constant 0 : i32
    return %arg0, %c0_i32, %c0_i32_0 : i32, i32, i32
  }
  func.func @transform_13(%arg0: i32) -> (i32, i32) {
    %c0_i32 = arith.constant 0 : i32
    %c0_i32_0 = arith.constant 0 : i32
    %c0_i32_1 = arith.constant 0 : i32
    return %c0_i32, %c0_i32_0 : i32, i32
  }
  func.func @transform_14(%arg0: i32) -> (i32, i32) {
    %c0_i32 = arith.constant 0 : i32
    %c0_i32_0 = arith.constant 0 : i32
    %c0_i32_1 = arith.constant 0 : i32
    return %c0_i32, %c0_i32_0 : i32, i32
  }
  func.func @transform_15(%arg0: i32) -> (i32, i32) {
    %c0_i32 = arith.constant 0 : i32
    %c0_i32_0 = arith.constant 0 : i32
    %c0_i32_1 = arith.constant 0 : i32
    return %c0_i32, %c0_i32_0 : i32, i32
  }
}

</mosaic_0001>

<bundles_post_ra>
// kernel: tpu_custom_call.1
= control target key start
LH: loop header
LB: loop body
LE: loop exit
PB: predicated region body
PF: predicated region fallthrough
CT: control target
= control target key end

     0   :  { %s3109_s20 = smov 0   ;;  %s3444_s0 = inlined_call_operand.vmem [shape: f32[2,8,32], index: 0, kind: input, shape index: {}]   ;;  %s3445_s1 = inlined_call_operand.vmem [shape: f32[2,32,96], index: 1, kind: input, shape index: {}]   ;;  %s3446_s2 = inlined_call_operand.vmem [shape: f32[2,1,96], index: 2, kind: input, shape index: {}]   ;;  %s3447_s3 = inlined_call_operand.vmem [shape: f32[2,32,32], index: 3, kind: input, shape index: {}]   ;;  %s3448_s4 = inlined_call_operand.vmem [shape: f32[2,1,32], index: 4, kind: input, shape index: {}]   ;;  %s3449_s5 = inlined_call_operand.vmem [shape: f32[2,32,128], index: 5, kind: input, shape index: {}]   ;;  %s3450_s6 = inlined_call_operand.vmem [shape: f32[2,1,128], index: 6, kind: input, shape index: {}]   ;;  %s3451_s7 = inlined_call_operand.vmem [shape: f32[2,128,32], index: 7, kind: input, shape index: {}]   ;;  %s3452_s8 = inlined_call_operand.vmem [shape: f32[2,1,32], index: 8, kind: input, shape index: {}]   ;;  %s3453_s9 = inlined_call_operand.vmem [shape: f32[2,1,32], index: 9, kind: input, shape index: {}]   ;;  %s3454_s10 = inlined_call_operand.vmem [shape: f32[2,1,32], index: 10, kind: input, shape index: {}]   ;;  %s3455_s11 = inlined_call_operand.vmem [shape: f32[2,1,32], index: 11, kind: input, shape index: {}]   ;;  %s3456_s12 = inlined_call_operand.vmem [shape: f32[2,1,32], index: 12, kind: input, shape index: {}]   ;;  %s3457_s13 = inlined_call_operand.vmem [shape: f32[1,32], index: 13, kind: input, shape index: {}]   ;;  %s3458_s14 = inlined_call_operand.<no memory space> [shape: f32[1,1], index: 14, kind: input, shape index: {}]   ;;  %s3459_s15 = inlined_call_operand.vmem [shape: f32[2,1], index: 15, kind: output, shape index: {}]  }
   0x1   :  { %3461 = sst [smem:[#allocation5_spill]] %s3445_s1  ;;  %v20_v0 = vstv %s3458_s14 }
   0x2   :  { %3462 = sst [smem:[#allocation6_spill]] %s3447_s3  ;;  %21 = vst [vmem:[#allocation3] sm:$0x1] %v20_v0 }
   0x3   :  { %3463 = sst [smem:[#allocation7_spill]] %s3449_s5 }
   0x4   :  { %3464 = sst [smem:[#allocation8_spill]] %s3450_s6 }
   0x5   :  { %3465 = sst [smem:[#allocation9_spill]] %s3457_s13 }
   0x6   :  { %3466 = sst [smem:[#allocation10_spill]] %s3459_s15 }
   0x7 LB: > { %3467 = sst [smem:[#allocation4_spill]] %s3007_s20  ;;  %s3115_s21 = sadd.s32 4294967295, %s3007_s20   ;;  %s3007_s20 = sphi %s3109_s20, %s27_s20  }
   0x8   : > { %p2663_p0 = scmp.ge.s32.totalorder %s3007_s20, 1  ;;  %p528_p1 = scmp.lt.s32.totalorder %s3007_s20, 3 }
   0xa   : > { %p529_p2 = pnand %p2663_p0, %p528_p1 }
   0xb   : > { %p610_p3 = scmp.lt.s32.totalorder (!%p529_p2), %s3115_s21, 1  ;;  %s3468_s1 = sld [smem:[#allocation5_spill]] (!%p529_p2) }
   0xc   : > { %532 = sbr.rel (%p529_p2) target bundleno = 2609 (0xa31), region = 80  ;;  %s3469_s3 = sld [smem:[#allocation6_spill]] (!%p529_p2) }
   0xd   : > { %s3470_s5 = sld [smem:[#allocation7_spill]] (!%p529_p2)  ;;  %p2672_p4 = scmp.ne.s32.totalorder (!%p529_p2), %s3115_s21, 0 }
  0x11   : > { %s3121_s14 = scalar_select %p610_p3, %s3115_s21, 1 }
  0x12   : > { %s3472_s6 = sld [smem:[#allocation10_spill]] (!%p2672_p4) }
  0x13   : > { %s2716_s22 = sshll.u32 %s3121_s14, 5  ;;  %s2719_s27 = sshll.u32 %s3121_s14, 7 }
  0x14   : > { %s3131_s28 = scalar_lea.vmem %s3468_s1, %s2716_s22  ;;  %s3136_s16 = scalar_lea.vmem %s3469_s3, %s2716_s22 }
  0x15   : > { %s3145_s15 = scalar_lea.vmem %s3470_s5, %s2716_s22  ;;  %s3155_s29 = scalar_lea.vmem %s3451_s7, %s2719_s27 }
  0x16   : > { %s641_s17 = scalar_lea.vmem %s3452_s8, %s3121_s14  ;;  %s644_s13 = scalar_lea.vmem %s3453_s9, %s3121_s14 }
  0x17   : > { %s647_s5 = scalar_lea.vmem %s3454_s10, %s3121_s14  ;;  %s650_s26 = scalar_lea.vmem %s3455_s11, %s3121_s14 }
  0x18   : > { %s653_s25 = scalar_lea.vmem %s3456_s12, %s3121_s14  ;;  %657 = sbr.rel (%p2672_p4) target bundleno = 32 (0x20), region = 84 }
  0x1d   : > { %v658_v1 = vld [vmem:[%s3444_s0] sm:$0xff]  ;;  %vm660_vm0 = vcmask 261120   ;;  %v659_v2 = vld [vmem:[%s3444_s0 + $0x8] sm:$0xff]  ;;  %vm663_vm1 = vcmask 1024   ;;  %v3009_v3 = vmov 0.0  }
  0x1e   : > { %661 = vst.msk [vmem:[#allocation2] sm:$0xff] %vm660_vm0, %v658_v1  ;;  %662 = vst.msk [vmem:[#allocation2 + $0x8] sm:$0xff] %vm660_vm0, %v659_v2 }
  0x1f   : > { %664 = vst.msk [vmem:[%s3472_s6] sm:$0x3] %vm663_vm1, %v3009_v3 }
  0x20 PF: > { %v670_v4 = vld [vmem:[%s3131_s28 + $0x18] sm:$0xff]  ;;  %v669_v5 = vld [vmem:[%s3131_s28 + $0x10] sm:$0xff]  ;;  %vm678_vm2 = vcmask 261120   ;;  %v668_v7 = vld [vmem:[%s3131_s28 + $0x8] sm:$0xff]  ;;  %v3010_v10 = vmov 0.0   ;;  %vm3011_vm3 = vmmov 0   ;;  %s3473_s23 = scalar_lea.vmem %s3446_s2, %s3121_s14 }
  0x21   : > { %2788 = vmatprep.subr.mxu1 %v670_v4  ;;  %v667_v8 = vld [vmem:[%s3131_s28] sm:$0xff]  ;;  %2809 = vmatprep.subr.mxu0 %v3010_v10  ;;  %s3012_s24 = smov 120   ;;  %s3013_s1 = smov 96   ;;  %vm763_vm4 = vcmask 64512   ;;  %vm1433_vm5 = vcmask 130048   ;;  %vm1435_vm6 = vcmask 195584  }
  0x22   : > { %2789 = vmatpush3.msra.mxu1 %v670_v4  ;;  %2811 = vmatprep.mubr.msk.f32.mxu0 %vm3011_vm3, %v3010_v10  ;;  %v2673_v12 = vld [vmem:[%s3473_s23] ss:$0 sm:$0xff]  ;;  %s3014_s3 = smov 80   ;;  %s3015_s27 = smov 88  }
  0x23   : > { %2790 = vmatprep.subr.mxu1 %v669_v5  ;;  %s3016_s19 = smov 72   ;;  %s3017_s30 = smov 112  }
  0x24   : > { %2791 = vmatpush3.msra.mxu1 %v669_v5  ;;  %s3018_s18 = smov 104   ;;  %s3019_s20 = smov 56  }
  0x25   : > { %v3189_v6 = vld [vmem:[#allocation2] sm:$0xff]  ;;  %2792 = vmatprep.subr.mxu1 %v668_v7  ;;  %v3195_v9 = vld [vmem:[#allocation2 + $0x8] sm:$0xff]  ;;  %s3020_s6 = smov 64   ;;  %s3021_s28 = smov 40  }
  0x26   : > { %2796 = vmatprep.mubr.msk.f32.mxu1 %vm678_vm2, %v3189_v6  ;;  %2793 = vmatpush3.msra.mxu1 %v668_v7  ;;  %s3022_s22 = smov 48   ;;  %s3023_s23 = smov 8  }
  0x27   : > { %2794 = vmatprep.subr.mxu1 %v667_v8  ;;  %p2711_p5 = scmp.ne.s32.totalorder %s3115_s21, 1 }
  0x28   : > { %2795 = vmatpush3.msra.mxu1 %v667_v8  ;;  %s3478_s21 = sld [smem:[#allocation10_spill]] (!%p2711_p5) }
  0x29   : > { %2797 = vmatmul.mubr.msk.f32.vlgmr.msra.gmra.mxu1 %vm678_vm2, %v3195_v9  ;;  %2799 = vmatprep.subr.mxu1 %v3010_v10 }
  0x2a   : > { %2801 = vmatprep.mubr.msk.f32.mxu1 %vm3011_vm3, %v3010_v10 }
  0xe9   : > { %v2798_v11 = vpop.f32.mrf.mxu1 }
  0xea   : > { %v3218_v15 = vadd.f32 %v2798_v11, %v2673_v12 }
  0xeb   : > { %v751_v13 = vpop.f32.mrf.mxu1 }
  0xec   : > { %v3210_v14 = vadd.f32 %v2673_v12, %v751_v13 }
  0xee   : > { %925 = vrot.lane.b32.xlu1 %v3210_v14, %s3012_s24  ;;  %761 = vrot.lane.b32.xlu0 %v3210_v14, %s3013_s1 }
  0xf2   : > { %1092 = vrot.lane.b32.xlu1 %v3210_v14, %s3014_s3  ;;  %927 = vrot.lane.b32.xlu0 %v3210_v14, %s3015_s27 }
  0xf6   : > { %1257 = vrot.lane.b32.xlu1 %v3210_v14, %s3016_s19  ;;  %1090 = vrot.lane.b32.xlu0 %v3210_v14, %s3017_s30 }
  0xfa   : > { %1438 = vrot.lane.b32.xlu1 %v3218_v15, %s3013_s1  ;;  %1255 = vrot.lane.b32.xlu0 %v3210_v14, %s3018_s18  ;;  %s3025_s1 = smov 24  }
  0xfe   : > { %1601 = vrot.lane.b32.xlu1 %v3218_v15, %s3012_s24  ;;  %1603 = vrot.lane.b32.xlu0 %v3218_v15, %s3015_s27  ;;  %s3024_s24 = smov 16   ;;  %s3474_s27 = scalar_lea.vmem %s3448_s4, %s3121_s14 }
 0x102   : > { %1766 = vrot.lane.b32.xlu1 %v3218_v15, %s3017_s30  ;;  %1768 = vrot.lane.b32.xlu0 %v3218_v15, %s3014_s3 }
 0x106   : > { %1931 = vrot.lane.b32.xlu1 %v3218_v15, %s3018_s18  ;;  %1933 = vrot.lane.b32.xlu0 %v3218_v15, %s3016_s19 }
 0x10a   : > { %1014 = vrot.lane.b32.xlu1 %v3210_v14, %s3019_s20  ;;  %849 = vrot.lane.b32.xlu0 %v3210_v14, %s3020_s6 }
 0x160   : > { %v926_v16 = vpop.permute.xlu1 %925  ;;  %v762_v17 = vpop.permute.xlu0 %761 }
 0x161   : > { %2800 = vmatpush3.xpose.msk.msra.mxu1 %vm763_vm4, %v762_v17 }
 0x162   : > { %2804 = vmatprep.subr.mxu1 %v3010_v10 }
 0x164   : > { %v1093_v18 = vpop.permute.xlu1 %1092  ;;  %2802 = vmatmul.mubr.msk.f32.vlgmr.msra.gmra.mxu1 %vm763_vm4, %v3210_v14  ;;  %v928_v19 = vpop.permute.xlu0 %927 }
 0x165   : > { %2810 = vmatpush3.xpose.msk.msra.mxu0 %vm763_vm4, %v928_v19  ;;  %2806 = vmatprep.mubr.msk.f32.mxu1 %vm3011_vm3, %v3010_v10 }
 0x166   : > { %2819 = vmatprep.subr.mxu0 %v3010_v10 }
 0x168   : > { %v1258_v20 = vpop.permute.xlu1 %1257  ;;  %2812 = vmatmul.mubr.msk.f32.vlgmr.msra.gmra.mxu0 %vm763_vm4, %v926_v16  ;;  %v1091_v21 = vpop.permute.xlu0 %1090 }
 0x169   : > { %2820 = vmatpush3.xpose.msk.msra.mxu0 %vm763_vm4, %v1093_v18  ;;  %2821 = vmatprep.mubr.msk.f32.mxu0 %vm3011_vm3, %v3010_v10 }
 0x16a   : > { %2829 = vmatprep.subr.mxu0 %v3010_v10 }
 0x16c   : > { %2822 = vmatmul.mubr.msk.f32.vlgmr.msra.gmra.mxu0 %vm763_vm4, %v1091_v21  ;;  %v1256_v22 = vpop.permute.xlu0 %1255  ;;  %v1439_v23 = vpop.permute.xlu1 %1438 }
 0x16d   : > { %2830 = vmatpush3.xpose.msk.msra.mxu0 %vm763_vm4, %v1258_v20  ;;  %2831 = vmatprep.mubr.msk.f32.mxu0 %vm3011_vm3, %v3010_v10 }
 0x16e   : > { %2839 = vmatprep.subr.mxu0 %v3010_v10 }
 0x170   : > { %2832 = vmatmul.mubr.msk.f32.vlgmr.msra.gmra.mxu0 %vm763_vm4, %v1256_v22  ;;  %v1604_v24 = vpop.permute.xlu0 %1603  ;;  %v1602_v25 = vpop.permute.xlu1 %1601 }
 0x171   : > { %2840 = vmatpush3.xpose.msk.msra.mxu0 %vm763_vm4, %v1439_v23  ;;  %2841 = vmatprep.mubr.msk.f32.mxu0 %vm3011_vm3, %v3010_v10 }
 0x172   : > { %2849 = vmatprep.subr.mxu0 %v3010_v10 }
 0x174   : > { %2842 = vmatmul.mubr.msk.f32.vlgmr.msra.gmra.mxu0 %vm763_vm4, %v3218_v15  ;;  %v1769_v26 = vpop.permute.xlu0 %1768  ;;  %v1767_v28 = vpop.permute.xlu1 %1766 }
 0x175   : > { %2850 = vmatpush3.xpose.msk.msra.mxu0 %vm763_vm4, %v1604_v24  ;;  %2851 = vmatprep.mubr.msk.f32.mxu0 %vm3011_vm3, %v3010_v10 }
 0x176   : > { %2859 = vmatprep.subr.mxu0 %v3010_v10 }
 0x178   : > { %2852 = vmatmul.mubr.msk.f32.vlgmr.msra.gmra.mxu0 %vm763_vm4, %v1602_v25  ;;  %v1934_v27 = vpop.permute.xlu0 %1933  ;;  %v1932_v30 = vpop.permute.xlu1 %1931 }
 0x179   : > { %2860 = vmatpush3.xpose.msk.msra.mxu0 %vm763_vm4, %v1769_v26  ;;  %2861 = vmatprep.mubr.msk.f32.mxu0 %vm3011_vm3, %v3010_v10 }
 0x17a   : > { %2869 = vmatprep.subr.mxu0 %v3010_v10 }
 0x17c   : > { %2862 = vmatmul.mubr.msk.f32.vlgmr.msra.gmra.mxu0 %vm763_vm4, %v1767_v28  ;;  %v850_v29 = vpop.permute.xlu0 %849  ;;  %v3284_v55 = vpop.permute.xlu1 %1014 }
 0x17d   : > { %2805 = vmatpush3.msra.mxu1 %v850_v29  ;;  %2870 = vmatpush3.xpose.msk.msra.mxu0 %vm763_vm4, %v1934_v27 }
 0x17e   : > { %2871 = vmatprep.mubr.msk.f32.mxu0 %vm3011_vm3, %v3010_v10  ;;  %2814 = vmatprep.subr.mxu1 %v3010_v10 }
 0x180   : > { %2872 = vmatmul.mubr.msk.f32.vlgmr.msra.gmra.mxu0 %vm763_vm4, %v1932_v30 }
 0x224   : > { %v834_v31 = vpop.f32.mrf.mxu1 }
 0x225   : > { %v838_v32 = vsel %vm763_vm4, %v834_v31, -inf }
 0x226   : > { %839 = vmax.xlane.f32.xlu0 %v838_v32  ;;  %v2803_v33 = vpop.f32.mrf.mxu1 }
 0x228   : > { %v999_v34 = vpop.f32.mrf.mxu0 }
 0x229   : > { %v1003_v35 = vsel %vm763_vm4, %v999_v34, -inf }
 0x22a   : > { %1004 = vmax.xlane.f32.xlu1 %v1003_v35  ;;  %v2813_v36 = vpop.f32.mrf.mxu0 }
 0x22c   : > { %v1164_v37 = vpop.f32.mrf.mxu0 }
 0x22d   : > { %v1168_v38 = vsel %vm763_vm4, %v1164_v37, -inf }
 0x22e   : > { %1169 = vmax.xlane.f32.xlu0 %v1168_v38  ;;  %v2823_v39 = vpop.f32.mrf.mxu0 }
 0x230   : > { %v1329_v40 = vpop.f32.mrf.mxu0 }
 0x231   : > { %v1333_v41 = vsel %vm763_vm4, %v1329_v40, -inf }
 0x232   : > { %1334 = vmax.xlane.f32.xlu0 %v1333_v41  ;;  %v2833_v42 = vpop.f32.mrf.mxu0 }
 0x234   : > { %v1510_v43 = vpop.f32.mrf.mxu0 }
 0x235   : > { %v1514_v44 = vsel %vm763_vm4, %v1510_v43, -inf }
 0x236   : > { %1515 = vmax.xlane.f32.xlu1 %v1514_v44  ;;  %v2843_v45 = vpop.f32.mrf.mxu0 }
 0x238   : > { %v1675_v46 = vpop.f32.mrf.mxu0 }
 0x239   : > { %v1679_v47 = vsel %vm763_vm4, %v1675_v46, -inf }
 0x23a   : > { %1680 = vmax.xlane.f32.xlu0 %v1679_v47  ;;  %v2853_v48 = vpop.f32.mrf.mxu0 }
 0x23c   : > { %v1840_v49 = vpop.f32.mrf.mxu0 }
 0x23d   : > { %v1844_v50 = vsel %vm763_vm4, %v1840_v49, -inf }
 0x23e   : > { %1845 = vmax.xlane.f32.xlu1 %v1844_v50  ;;  %v2863_v51 = vpop.f32.mrf.mxu0 }
 0x240   : > { %v2005_v52 = vpop.f32.mrf.mxu0 }
 0x241   : > { %v2009_v53 = vsel %vm763_vm4, %v2005_v52, -inf }
 0x242   : > { %2010 = vmax.xlane.f32.xlu0 %v2009_v53  ;;  %v2873_v54 = vpop.f32.mrf.mxu0 }
 0x24f   : > { %1344 = vrot.lane.b32.xlu1 %v3210_v14, %s3021_s28 }
 0x258   : > { %1179 = vrot.lane.b32.xlu0 %v3210_v14, %s3022_s22 }
 0x2af   : > { %v840_v56 = vpop.xlane.xlu0 %839 }
 0x2b0   : > { %v841_v57 = vsub.f32 %v834_v31, %v840_v56 }
 0x2b2   : > { %v842_v58 = vmul.f32 1.442695, %v841_v57 }
 0x2b3   : > { %v1005_v59 = vpop.xlane.xlu1 %1004 }
 0x2b4   : > { %2961 = vpow2.f32 %v842_v58  ;;  %v1006_v60 = vsub.f32 %v999_v34, %v1005_v59 }
 0x2b6   : > { %v1007_v61 = vmul.f32 1.442695, %v1006_v60 }
 0x2b7   : > { %v1170_v62 = vpop.xlane.xlu0 %1169 }
 0x2b8   : > { %2963 = vpow2.f32 %v1007_v61  ;;  %v1171_v63 = vsub.f32 %v1164_v37, %v1170_v62 }
 0x2ba   : > { %v1172_v0 = vmul.f32 1.442695, %v1171_v63 }
 0x2bb   : > { %v1335_v1 = vpop.xlane.xlu0 %1334 }
 0x2bc   : > { %2965 = vpow2.f32 %v1172_v0  ;;  %v1336_v2 = vsub.f32 %v1329_v40, %v1335_v1 }
 0x2be   : > { %v1337_v3 = vmul.f32 1.442695, %v1336_v2 }
 0x2bf   : > { %v1516_v16 = vpop.xlane.xlu1 %1515 }
 0x2c0   : > { %2967 = vpow2.f32 %v1337_v3  ;;  %v1517_v17 = vsub.f32 %v1510_v43, %v1516_v16 }
 0x2c1   : > { %v2962_v4 = vpop.eup %2961 }
 0x2c2   : > { %v844_v5 = vsel %vm763_vm4, %v2962_v4, 0.0  ;;  %v1518_v21 = vmul.f32 1.442695, %v1517_v17 }
 0x2c3   : > { %845 = vadd.xlane.f32.xlu1 %v844_v5  ;;  %v1681_v18 = vpop.xlane.xlu0 %1680 }
 0x2c4   : > { %v1682_v20 = vsub.f32 %v1675_v46, %v1681_v18  ;;  %2969 = vpow2.f32 %v1518_v21 }
 0x2c5   : > { %v2964_v7 = vpop.eup %2963 }
 0x2c6   : > { %v1009_v8 = vsel %vm763_vm4, %v2964_v7, 0.0  ;;  %v1683_v24 = vmul.f32 1.442695, %v1682_v20 }
 0x2c7   : > { %1010 = vadd.xlane.f32.xlu0 %v1009_v8  ;;  %v1846_v19 = vpop.xlane.xlu1 %1845 }
 0x2c8   : > { %v1847_v22 = vsub.f32 %v1840_v49, %v1846_v19  ;;  %2971 = vpow2.f32 %v1683_v24 }
 0x2c9   : > { %v2966_v11 = vpop.eup %2965 }
 0x2ca   : > { %v1174_v12 = vsel %vm763_vm4, %v2966_v11, 0.0  ;;  %v1848_v25 = vmul.f32 1.442695, %v1847_v22 }
 0x2cb   : > { %1175 = vadd.xlane.f32.xlu1 %v1174_v12  ;;  %v2011_v23 = vpop.xlane.xlu0 %2010  ;;  %v1345_v36 = vpop.permute.xlu1 %1344  ;;  %v2113_v12 = vld [vmem:[%s3136_s16 + $0x10] sm:$0xff] }
 0x2cc   : > { %v2012_v26 = vsub.f32 %v2005_v52, %v2011_v23  ;;  %2973 = vpow2.f32 %v1848_v25 }
 0x2cd   : > { %v3289_v13 = vpop.eup %2967 }
 0x2ce   : > { %v1339_v14 = vsel %vm763_vm4, %v3289_v13, 0.0  ;;  %v2013_v27 = vmul.f32 1.442695, %v2012_v26 }
 0x2cf   : > { %1340 = vadd.xlane.f32.xlu0 %v1339_v14  ;;  %v1180_v37 = vpop.permute.xlu0 %1179  ;;  %v2111_v14 = vld [vmem:[%s3136_s16] sm:$0xff] }
 0x2d0   : > { %2975 = vpow2.f32 %v2013_v27 }
 0x2d1   : > { %v2970_v28 = vpop.eup %2969 }
 0x2d2   : > { %v1520_v30 = vsel %vm763_vm4, %v2970_v28, 0.0 }
 0x2d5   : > { %v3297_v29 = vpop.eup %2971 }
 0x2d6   : > { %v1685_v33 = vsel %vm763_vm4, %v3297_v29, 0.0 }
 0x2d9   : > { %v3300_v31 = vpop.eup %2973 }
 0x2da   : > { %v1850_v32 = vsel %vm763_vm4, %v3300_v31, 0.0 }
 0x2dc   : > { %1690 = vrot.lane.b32.xlu1 %v3218_v15, %s3019_s20  ;;  %s3475_s20 = sld [smem:[#allocation8_spill]] }
 0x2dd   : > { %v3306_v34 = vpop.eup %2975 }
 0x2de   : > { %v2015_v35 = vsel %vm763_vm4, %v3306_v34, 0.0 }
 0x2e5   : > { %1525 = vrot.lane.b32.xlu0 %v3218_v15, %s3020_s6  ;;  %s3476_s6 = scalar_lea.vmem %s3475_s20, %s3121_s14 }
 0x300   : > { %1521 = vadd.xlane.f32.xlu1 %v1520_v30 }
 0x304   : > { %1851 = vadd.xlane.f32.xlu1 %v1850_v32  ;;  %1686 = vadd.xlane.f32.xlu0 %v1685_v33 }
 0x308   : > { %2016 = vadd.xlane.f32.xlu1 %v2015_v35 }
 0x319   : > { %2020 = vrot.lane.b32.xlu1 %v3218_v15, %s3021_s28 }
 0x31a   : > { %1855 = vrot.lane.b32.xlu0 %v3218_v15, %s3022_s22 }
 0x34c   : > { %v846_v38 = vpop.xlane.xlu1 %845 }
 0x34d   : > { %2977 = vrcp.f32 %v846_v38 }
 0x350   : > { %v1011_v39 = vpop.xlane.xlu0 %1010 }
 0x351   : > { %2979 = vrcp.f32 %v1011_v39 }
 0x354   : > { %v1176_v40 = vpop.xlane.xlu1 %1175 }
 0x355   : > { %2981 = vrcp.f32 %v1176_v40 }
 0x358   : > { %v1341_v41 = vpop.xlane.xlu0 %1340  ;;  %v1691_v50 = vpop.permute.xlu1 %1690 }
 0x359   : > { %2983 = vrcp.f32 %v1341_v41 }
 0x35a   : > { %v2978_v42 = vpop.eup %2977 }
 0x35b   : > { %v848_v43 = vmul.f32 %v2978_v42, %v2962_v4 }
 0x35c   : > { %v1526_v49 = vpop.permute.xlu0 %1525 }
 0x35d   : > { %2807 = vmatmul.mubr.msk.f32.vlgmr.msra.gmra.mxu1 %vm763_vm4, %v848_v43 }
 0x35e   : > { %v2980_v44 = vpop.eup %2979  ;;  %2815 = vmatpush3.msra.mxu1 %v3284_v55  ;;  %2816 = vmatprep.mubr.msk.f32.mxu1 %vm3011_vm3, %v3010_v10 }
 0x35f   : > { %2824 = vmatprep.subr.mxu1 %v3010_v10  ;;  %v1013_v15 = vmul.f32 %v2980_v44, %v2964_v7 }
 0x361   : > { %2817 = vmatmul.mubr.msk.f32.vlgmr.msra.gmra.mxu1 %vm763_vm4, %v1013_v15 }
 0x362   : > { %v2982_v45 = vpop.eup %2981  ;;  %2825 = vmatpush3.msra.mxu1 %v1180_v37  ;;  %2826 = vmatprep.mubr.msk.f32.mxu1 %vm3011_vm3, %v3010_v10 }
 0x363   : > { %2834 = vmatprep.subr.mxu1 %v3010_v10  ;;  %v1178_v46 = vmul.f32 %v2982_v45, %v2966_v11  ;;  %v2114_v11 = vld [vmem:[%s3136_s16 + $0x18] sm:$0xff] }
 0x365   : > { %2827 = vmatmul.mubr.msk.f32.vlgmr.msra.gmra.mxu1 %vm763_vm4, %v1178_v46 }
 0x366   : > { %v2984_v47 = vpop.eup %2983  ;;  %2835 = vmatpush3.msra.mxu1 %v1345_v36  ;;  %2836 = vmatprep.mubr.msk.f32.mxu1 %vm3011_vm3, %v3010_v10  ;;  %v2700_v36 = vld [vmem:[%s3474_s27] ss:$0 sm:$0xff] }
 0x367   : > { %2844 = vmatprep.subr.mxu1 %v3010_v10  ;;  %v1343_v48 = vmul.f32 %v2984_v47, %v3289_v13  ;;  %v2112_v13 = vld [vmem:[%s3136_s16 + $0x8] sm:$0xff]  ;;  %s3477_s16 = sld [smem:[#allocation9_spill]] (!%p2711_p5) }
 0x369   : > { %2837 = vmatmul.mubr.msk.f32.vlgmr.msra.gmra.mxu1 %vm763_vm4, %v1343_v48 }
 0x36a   : > { %2845 = vmatpush3.msra.mxu1 %v1526_v49  ;;  %2846 = vmatprep.mubr.msk.f32.mxu1 %vm3011_vm3, %v3010_v10 }
 0x36b   : > { %2854 = vmatprep.subr.mxu1 %v3010_v10 }
 0x389   : > { %v1522_v51 = vpop.xlane.xlu1 %1521 }
 0x38a   : > { %2985 = vrcp.f32 %v1522_v51 }
 0x38d   : > { %v1852_v52 = vpop.xlane.xlu1 %1851  ;;  %v1687_v53 = vpop.xlane.xlu0 %1686 }
 0x38e   : > { %2987 = vrcp.f32 %v1687_v53  ;;  %v2252_v53 = vld [vmem:[%s3145_s15 + $0x10] sm:$0xff] }
 0x38f   : > { %2989 = vrcp.f32 %v1852_v52  ;;  %v2253_v52 = vld [vmem:[%s3145_s15 + $0x18] sm:$0xff] }
 0x391   : > { %v2017_v54 = vpop.xlane.xlu1 %2016  ;;  %v1856_v60 = vpop.permute.xlu0 %1855 }
 0x392   : > { %2991 = vrcp.f32 %v2017_v54  ;;  %v2251_v54 = vld [vmem:[%s3145_s15 + $0x8] sm:$0xff] }
 0x395   : > { %v2021_v63 = vpop.permute.xlu1 %2020 }
 0x397   : > { %v2986_v55 = vpop.eup %2985 }
 0x398   : > { %v1524_v56 = vmul.f32 %v2986_v55, %v2970_v28  ;;  %v2250_v55 = vld [vmem:[%s3145_s15] sm:$0xff] }
 0x39a   : > { %2847 = vmatmul.mubr.msk.f32.vlgmr.msra.gmra.mxu1 %vm763_vm4, %v1524_v56  ;;  %v2359_v56 = vld [vmem:[%s3155_s29 + $0x78] sm:$0xff] }
 0x39b   : > { %2855 = vmatpush3.msra.mxu1 %v1691_v50  ;;  %2856 = vmatprep.mubr.msk.f32.mxu1 %vm3011_vm3, %v3010_v10  ;;  %v2988_v57 = vpop.eup %2987 }
 0x39c   : > { %2864 = vmatprep.subr.mxu1 %v3010_v10  ;;  %v1689_v58 = vmul.f32 %v2988_v57, %v3297_v29  ;;  %v2990_v59 = vpop.eup %2989  ;;  %v2358_v57 = vld [vmem:[%s3155_s29 + $0x70] sm:$0xff]  ;;  %2901 = vmatprep.subr.mxu0 %v2359_v56 }
 0x39d   : > { %v1854_v61 = vmul.f32 %v2990_v59, %v3300_v31  ;;  %2902 = vmatpush3.msra.mxu0 %v2359_v56  ;;  %v2356_v59 = vld [vmem:[%s3155_s29 + $0x60] sm:$0xff] }
 0x39e   : > { %2857 = vmatmul.mubr.msk.f32.vlgmr.msra.gmra.mxu1 %vm763_vm4, %v1689_v58  ;;  %v2357_v58 = vld [vmem:[%s3155_s29 + $0x68] sm:$0xff]  ;;  %2903 = vmatprep.subr.mxu0 %v2358_v57 }
 0x39f   : > { %2865 = vmatpush3.msra.mxu1 %v1856_v60  ;;  %2866 = vmatprep.mubr.msk.f32.mxu1 %vm3011_vm3, %v3010_v10  ;;  %v2992_v62 = vpop.eup %2991  ;;  %v2355_v60 = vld [vmem:[%s3155_s29 + $0x58] sm:$0xff] }
 0x3a0   : > { %2874 = vmatprep.subr.mxu1 %v3010_v10  ;;  %v2019_v0 = vmul.f32 %v2992_v62, %v3306_v34  ;;  %2904 = vmatpush3.msra.mxu0 %v2358_v57  ;;  %v2353_v62 = vld [vmem:[%s3155_s29 + $0x48] sm:$0xff]  ;;  %v2709_v57 = vld [vmem:[%s650_s26] ss:$0 sm:$0xff] }
 0x3a1   : > { %2905 = vmatprep.subr.mxu0 %v2357_v58 }
 0x3a2   : > { %2867 = vmatmul.mubr.msk.f32.vlgmr.msra.gmra.mxu1 %vm763_vm4, %v1854_v61  ;;  %2906 = vmatpush3.msra.mxu0 %v2357_v58  ;;  %v2354_v61 = vld [vmem:[%s3155_s29 + $0x50] sm:$0xff] }
 0x3a3   : > { %2875 = vmatpush3.msra.mxu1 %v2021_v63  ;;  %2876 = vmatprep.mubr.msk.f32.mxu1 %vm3011_vm3, %v3010_v10  ;;  %v2352_v63 = vld [vmem:[%s3155_s29 + $0x40] sm:$0xff] }
 0x3a4   : > { %2879 = vmatprep.subr.mxu1 %v2114_v11  ;;  %2907 = vmatprep.subr.mxu0 %v2356_v59 }
 0x3a5   : > { %2908 = vmatpush3.msra.mxu0 %v2356_v59 }
 0x3a6   : > { %2877 = vmatmul.mubr.msk.f32.vlgmr.msra.gmra.mxu1 %vm763_vm4, %v2019_v0  ;;  %2909 = vmatprep.subr.mxu0 %v2355_v60  ;;  %v2351_v0 = vld [vmem:[%s3155_s29 + $0x38] sm:$0xff] }
 0x3a7   : > { %2880 = vmatpush3.msra.mxu1 %v2114_v11  ;;  %2910 = vmatpush3.msra.mxu0 %v2355_v60  ;;  %v2710_v60 = vld [vmem:[%s653_s25] ss:$0 sm:$0xff] }
 0x3a8   : > { %2881 = vmatprep.subr.mxu1 %v2113_v12  ;;  %2911 = vmatprep.subr.mxu0 %v2354_v61 }
 0x3a9   : > { %2882 = vmatpush3.msra.mxu1 %v2113_v12  ;;  %2912 = vmatpush3.msra.mxu0 %v2354_v61 }
 0x3aa   : > { %2883 = vmatprep.subr.mxu1 %v2112_v13  ;;  %2913 = vmatprep.subr.mxu0 %v2353_v62 }
 0x3ab   : > { %2884 = vmatpush3.msra.mxu1 %v2112_v13  ;;  %2914 = vmatpush3.msra.mxu0 %v2353_v62  ;;  %v2703_v13 = vld [vmem:[%s644_s13] ss:$0 sm:$0xff] }
 0x3ac   : > { %2885 = vmatprep.subr.mxu1 %v2111_v14  ;;  %2915 = vmatprep.subr.mxu0 %v2352_v63 }
 0x3ad   : > { %2886 = vmatpush3.msra.mxu1 %v2111_v14  ;;  %2916 = vmatpush3.msra.mxu0 %v2352_v63 }
 0x3ae   : > { %2890 = vmatprep.subr.mxu1 %v2253_v52  ;;  %2917 = vmatprep.subr.mxu0 %v2351_v0 }
 0x3af   : > { %2918 = vmatpush3.msra.mxu0 %v2351_v0 }
 0x41d   : > { %v921_v1 = vpop.f32.mrf.mxu1 }
 0x41f   : > { %v2808_v2 = vpop.f32.mrf.mxu1 }
 0x420   : > { %v2349_v2 = vld [vmem:[%s3155_s29 + $0x28] sm:$0xff] }
 0x421   : > { %v1086_v3 = vpop.f32.mrf.mxu1 }
 0x422   : > { %1421 = vrot.lane.b32.xlu0 %v1086_v3, %s3023_s23  ;;  %v2348_v3 = vld [vmem:[%s3155_s29 + $0x20] sm:$0xff] }
 0x423   : > { %v2818_v4 = vpop.f32.mrf.mxu1 }
 0x425   : > { %v1251_v5 = vpop.f32.mrf.mxu1 }
 0x426   : > { %1425 = vrot.lane.b32.xlu1 %v1251_v5, %s3024_s24 }
 0x427   : > { %v2828_v7 = vpop.f32.mrf.mxu1 }
 0x429   : > { %v1416_v8 = vpop.f32.mrf.mxu1 }
 0x42a   : > { %1429 = vrot.lane.b32.xlu1 %v1416_v8, %s3025_s1 }
 0x42b   : > { %v2838_v10 = vpop.f32.mrf.mxu1 }
 0x45a   : > { %v1597_v16 = vpop.f32.mrf.mxu1 }
 0x45c   : > { %v2848_v17 = vpop.f32.mrf.mxu1 }
 0x45e   : > { %v1762_v18 = vpop.f32.mrf.mxu1 }
 0x45f   : > { %2097 = vrot.lane.b32.xlu0 %v1762_v18, %s3023_s23 }
 0x460   : > { %v2858_v19 = vpop.f32.mrf.mxu1 }
 0x462   : > { %v1927_v20 = vpop.f32.mrf.mxu1 }
 0x463   : > { %2101 = vrot.lane.b32.xlu0 %v1927_v20, %s3024_s24 }
 0x464   : > { %v2868_v21 = vpop.f32.mrf.mxu1 }
 0x466   : > { %v2092_v22 = vpop.f32.mrf.mxu1 }
 0x467   : > { %2105 = vrot.lane.b32.xlu1 %v2092_v22, %s3025_s1 }
 0x468   : > { %v2878_v23 = vpop.f32.mrf.mxu1 }
 0x469   : > { %v2347_v23 = vld [vmem:[%s3155_s29 + $0x18] sm:$0xff] }
 0x494   : > { %v1422_v24 = vpop.permute.xlu0 %1421 }
 0x495   : > { %v1432_v26 = vsel %vm763_vm4, %v921_v1, %v1422_v24  ;;  %v2350_v1 = vld [vmem:[%s3155_s29 + $0x30] sm:$0xff] }
 0x496   : > { %2919 = vmatprep.subr.mxu0 %v2350_v1  ;;  %v2346_v24 = vld [vmem:[%s3155_s29 + $0x10] sm:$0xff] }
 0x497   : > { %2920 = vmatpush3.msra.mxu0 %v2350_v1 }
 0x498   : > { %v1426_v25 = vpop.permute.xlu1 %1425  ;;  %2921 = vmatprep.subr.mxu0 %v2349_v2 }
 0x499   : > { %v1434_v27 = vsel %vm1433_vm5, %v1432_v26, %v1426_v25  ;;  %2922 = vmatpush3.msra.mxu0 %v2349_v2  ;;  %v2345_v25 = vld [vmem:[%s3155_s29 + $0x8] sm:$0xff]  ;;  %v2344_v26 = vld [vmem:[%s3155_s29] sm:$0xff] }
 0x49a   : > { %2923 = vmatprep.subr.mxu0 %v2348_v3 }
 0x49b   : > { %2924 = vmatpush3.msra.mxu0 %v2348_v3 }
 0x49c   : > { %v1430_v28 = vpop.permute.xlu1 %1429  ;;  %2925 = vmatprep.subr.mxu0 %v2347_v23 }
 0x49d   : > { %v1436_v29 = vsel %vm1435_vm6, %v1434_v27, %v1430_v28  ;;  %2926 = vmatpush3.msra.mxu0 %v2347_v23  ;;  %v2705_v27 = vld [vmem:[%s3476_s6] ss:$0 sm:$0xff] }
 0x49e   : > { %2887 = vmatprep.mubr.msk.f32.mxu1 %vm678_vm2, %v1436_v29  ;;  %2927 = vmatprep.subr.mxu0 %v2346_v24 }
 0x49f   : > { %2928 = vmatpush3.msra.mxu0 %v2346_v24 }
 0x4a0   : > { %2929 = vmatprep.subr.mxu0 %v2345_v25 }
 0x4a1   : > { %2930 = vmatpush3.msra.mxu0 %v2345_v25 }
 0x4a2   : > { %2931 = vmatprep.subr.mxu0 %v2344_v26 }
 0x4a3   : > { %2932 = vmatpush3.msra.mxu0 %v2344_v26 }
 0x4d1   : > { %v2098_v30 = vpop.permute.xlu0 %2097 }
 0x4d2   : > { %v2108_v32 = vsel %vm763_vm4, %v1597_v16, %v2098_v30  ;;  %v2704_v16 = vld [vmem:[%s647_s5] ss:$0 sm:$0xff] }
 0x4d5   : > { %v2102_v31 = vpop.permute.xlu0 %2101 }
 0x4d6   : > { %v2109_v33 = vsel %vm1433_vm5, %v2108_v32, %v2102_v31 }
 0x4d9   : > { %v2106_v34 = vpop.permute.xlu1 %2105 }
 0x4da   : > { %v2110_v35 = vsel %vm1435_vm6, %v2109_v33, %v2106_v34  ;;  %v2708_v34 = vld [vmem:[%s641_s17] ss:$0 sm:$0xff] }
 0x4db   : > { %2888 = vmatmul.mubr.msk.f32.vlgmr.msra.gmra.mxu1 %vm678_vm2, %v2110_v35 }
 0x4dc   : > { %2891 = vmatpush3.msra.mxu1 %v2253_v52 }
 0x4dd   : > { %2892 = vmatprep.subr.mxu1 %v2252_v53 }
 0x4de   : > { %2893 = vmatpush3.msra.mxu1 %v2252_v53 }
 0x4df   : > { %2894 = vmatprep.subr.mxu1 %v2251_v54 }
 0x4e0   : > { %2895 = vmatpush3.msra.mxu1 %v2251_v54 }
 0x4e1   : > { %2896 = vmatprep.subr.mxu1 %v2250_v55 }
 0x4e2   : > { %2897 = vmatpush3.msra.mxu1 %v2250_v55 }
 0x59b   : > { %v2889_v37 = vpop.f32.mrf.mxu1 }
 0x59c   : > { %v2200_v38 = vadd.f32 %v2889_v37, %v2700_v36 }
 0x59d   : > { %v2194_v39 = vpop.f32.mrf.mxu1 }
 0x59e   : > { %v2195_v40 = vadd.f32 %v2700_v36, %v2194_v39  ;;  %v2204_v41 = vadd.f32 %v2200_v38, %v3195_v9 }
 0x5a0   : > { %v2208_v42 = vsel %vm678_vm2, %v2204_v41, 0.0  ;;  %v2203_v43 = vadd.f32 %v2195_v40, %v3189_v6 }
 0x5a1   : > { %2209 = vadd.xlane.f32.xlu1 %v2208_v42 }
 0x5a2   : > { %v2205_v44 = vsel %vm678_vm2, %v2203_v43, 0.0 }
 0x5a3   : > { %2206 = vadd.xlane.f32.xlu0 %v2205_v44 }
 0x62a   : > { %v2210_v15 = vpop.xlane.xlu1 %2209 }
 0x62b   : > { %v2213_v45 = vmul.f32 0.03125, %v2210_v15 }
 0x62c   : > { %v2207_v46 = vpop.xlane.xlu0 %2206 }
 0x62d   : > { %v2212_v47 = vmul.f32 0.03125, %v2207_v46  ;;  %v3364_v48 = vsub.f32 %v2204_v41, %v2213_v45 }
 0x62f   : > { %v3366_v49 = vsub.f32 %v2203_v43, %v2212_v47  ;;  %v2217_v50 = vmul.f32 %v3364_v48, %v3364_v48 }
 0x631   : > { %v2216_v9 = vmul.f32 %v3366_v49, %v3366_v49  ;;  %v2221_v51 = vsel %vm678_vm2, %v2217_v50, 0.0 }
 0x633   : > { %v2218_v6 = vsel %vm678_vm2, %v2216_v9, 0.0 }
 0x634   : > { %2219 = vadd.xlane.f32.xlu0 %v2218_v6 }
 0x638   : > { %2222 = vadd.xlane.f32.xlu0 %v2221_v51 }
 0x6bd   : > { %v2220_v4 = vpop.xlane.xlu0 %2219 }
 0x6be   : > { %v2224_v5 = vmul.f32 0.03125, %v2220_v4 }
 0x6c0   : > { %v2226_v7 = vadd.f32 1e-05, %v2224_v5 }
 0x6c1   : > { %v2223_v8 = vpop.xlane.xlu0 %2222 }
 0x6c2   : > { %2993 = vrsqrt.f32 %v2226_v7  ;;  %v2225_v10 = vmul.f32 0.03125, %v2223_v8 }
 0x6c4   : > { %v2227_v11 = vadd.f32 1e-05, %v2225_v10 }
 0x6c6   : > { %2995 = vrsqrt.f32 %v2227_v11 }
 0x6cf   : > { %v2994_v12 = vpop.eup %2993 }
 0x6d0   : > { %v2230_v14 = vmul.f32 %v2994_v12, %v3366_v49 }
 0x6d2   : > { %v2239_v17 = vmul.f32 %v2703_v13, %v2230_v14 }
 0x6d3   : > { %v2996_v18 = vpop.eup %2995 }
 0x6d4   : > { %v2231_v19 = vmul.f32 %v2996_v18, %v3364_v48  ;;  %v2248_v20 = vadd.f32 %v2704_v16, %v2239_v17 }
 0x6d6   : > { %v2240_v21 = vmul.f32 %v2703_v13, %v2231_v19  ;;  %2898 = vmatprep.mubr.msk.f32.mxu1 %vm678_vm2, %v2248_v20 }
 0x6d8   : > { %v2249_v22 = vadd.f32 %v2704_v16, %v2240_v21 }
 0x6da   : > { %2899 = vmatmul.mubr.msk.f32.vlgmr.msra.gmra.mxu1 %vm678_vm2, %v2249_v22 }
 0x79a   : > { %v2900_v28 = vpop.f32.mrf.mxu1 }
 0x79b   : > { %v2339_v29 = vadd.f32 %v2900_v28, %v2705_v27 }
 0x79c   : > { %v2333_v30 = vpop.f32.mrf.mxu1 }
 0x79d   : > { %v2334_v31 = vadd.f32 %v2705_v27, %v2333_v30  ;;  %v2343_v33 = vmax.f32 %v2339_v29, 0.0 }
 0x79f   : > { %v2342_v32 = vmax.f32 %v2334_v31, 0.0 }
 0x7a1   : > { %2933 = vmatprep.mubr.f32.mxu0 %v2342_v32 }
 0x7a2   : > { %2934 = vmatmul.mubr.f32.vlgmr.msra.gmra.mxu0 %v2343_v33 }
 0x862   : > { %v2935_v35 = vpop.f32.mrf.mxu0 }
 0x863   : > { %v2439_v36 = vadd.f32 %v2935_v35, %v2708_v34 }
 0x864   : > { %v2433_v37 = vpop.f32.mrf.mxu0 }
 0x865   : > { %v2434_v38 = vadd.f32 %v2708_v34, %v2433_v37  ;;  %v2443_v39 = vadd.f32 %v2439_v36, %v2249_v22 }
 0x867   : > { %v2447_v40 = vsel %vm678_vm2, %v2443_v39, 0.0  ;;  %v2442_v41 = vadd.f32 %v2434_v38, %v2248_v20 }
 0x868   : > { %2448 = vadd.xlane.f32.xlu0 %v2447_v40 }
 0x869   : > { %v2444_v42 = vsel %vm678_vm2, %v2442_v41, 0.0 }
 0x86a   : > { %2445 = vadd.xlane.f32.xlu1 %v2444_v42 }
 0x8f1   : > { %v2449_v43 = vpop.xlane.xlu0 %2448 }
 0x8f2   : > { %v2451_v44 = vmul.f32 0.03125, %v2449_v43 }
 0x8f3   : > { %v2446_v15 = vpop.xlane.xlu1 %2445 }
 0x8f4   : > { %v2453_v45 = vsub.f32 %v2443_v39, %v2451_v44  ;;  %v2450_v46 = vmul.f32 0.03125, %v2446_v15 }
 0x8f6   : > { %v2452_v47 = vsub.f32 %v2442_v41, %v2450_v46  ;;  %v2455_v48 = vmul.f32 %v2453_v45, %v2453_v45 }
 0x8f8   : > { %v2459_v49 = vsel %vm678_vm2, %v2455_v48, 0.0  ;;  %v2454_v9 = vmul.f32 %v2452_v47, %v2452_v47 }
 0x8f9   : > { %2460 = vadd.xlane.f32.xlu0 %v2459_v49 }
 0x8fa   : > { %v2456_v6 = vsel %vm678_vm2, %v2454_v9, 0.0 }
 0x8fb   : > { %2457 = vadd.xlane.f32.xlu1 %v2456_v6 }
 0x982   : > { %v2461_v50 = vpop.xlane.xlu0 %2460 }
 0x983   : > { %v2463_v51 = vmul.f32 0.03125, %v2461_v50 }
 0x984   : > { %v2458_v52 = vpop.xlane.xlu1 %2457 }
 0x985   : > { %v2465_v53 = vadd.f32 1e-05, %v2463_v51  ;;  %v2462_v54 = vmul.f32 0.03125, %v2458_v52 }
 0x987   : > { %2997 = vrsqrt.f32 %v2465_v53  ;;  %v2464_v55 = vadd.f32 1e-05, %v2462_v54 }
 0x989   : > { %2999 = vrsqrt.f32 %v2464_v55 }
 0x994   : > { %v2998_v56 = vpop.eup %2997 }
 0x995   : > { %v2469_v58 = vmul.f32 %v2998_v56, %v2453_v45 }
 0x996   : > { %v3000_v59 = vpop.eup %2999 }
 0x997   : > { %v2478_v61 = vmul.f32 %v2709_v57, %v2469_v58  ;;  %v2468_v62 = vmul.f32 %v3000_v59, %v2452_v47 }
 0x999   : > { %v2487_v63 = vadd.f32 %v2710_v60, %v2478_v61  ;;  %v2477_v0 = vmul.f32 %v2709_v57, %v2468_v62  ;;  %2493 = sbr.rel (%p2711_p5) target bundleno = 2609 (0xa31), region = 88 }
 0x99b   : > { %2489 = vst.msk [vmem:[#allocation2 + $0x8] sm:$0xff] %vm678_vm2, %v2487_v63  ;;  %v2486_v1 = vadd.f32 %v2710_v60, %v2477_v0 }
 0x99d   : > { %2488 = vst.msk [vmem:[#allocation2] sm:$0xff] %vm678_vm2, %v2486_v1 }
 0x99e   : > { %v2495_v2 = vrot.slane %v2486_v1, 7  ;;  %v2498_v3 = vrot.slane %v2487_v63, 6  ;;  %vm2500_vm7 = vcmask 1040384   ;;  %v2712_v4 = vld [vmem:[%s3477_s16] ss:$0 sm:$0xff]  ;;  %vm2510_vm8 = vcmask 254976  }
 0x99f   : > { %v2713_v10 = vld [vmem:[#allocation3] ss:$0 sm:$0xff]  ;;  %vm2522_vm9 = vcmask 1024  }
 0x9a0   : > { %v2501_v5 = vsel %vm2500_vm7, %v2495_v2, %v2498_v3 }
 0x9a1   : > { %v2509_v7 = vmul.f32 %v2712_v4, %v2501_v5 }
 0x9a3   : > { %v2511_v8 = vsel %vm2510_vm8, %v2509_v7, 0.0 }
 0x9a4   : > { %2512 = vadd.xlane.f32.xlu0 %v2511_v8 }
 0xa2d   : > { %v2513_v11 = vpop.xlane.xlu0 %2512 }
 0xa2e   : > { %v2521_v12 = vadd.f32 %v2713_v10, %v2513_v11 }
 0xa30   : > { %2523 = vst.msk [vmem:[%s3478_s21] sm:$0x3] %vm2522_vm9, %v2521_v12 }
 0xa31 PF: > { %s3479_s3 = sld [smem:[#allocation4_spill]] }
 0xa37   : > { %s27_s20 = sadd.s32 1, %s3479_s3  }
 0xa38   : > { %p24_p6 = scmp.ge.s32.totalorder %s27_s20, 4  }
 0xa3a   :  { %26 = sbr.rel (!%p24_p6) target bundleno = 7 (0x7), region = 147 }

</bundles_post_ra>
